<compile_context>
chip_gen: v6e
topology: v6e:2x2x1
jax: 0.10.0
libtpu: 0.0.40
codegen_flags: <defaults>
</compile_context>

<pallas_src>
import functools

import jax
import jax.numpy as jnp
from jax.experimental import pallas as pl
from jax.experimental.pallas import tpu as pltpu


# ---------------------------------------------------------------------------
# Kernel: single invocation, everything resident in VMEM.
# Gate order follows PyTorch: [ i | f | g | o ] along the 4*H lane axis.
# ---------------------------------------------------------------------------
def lstm_kernel(x_ref, wx_ref, b0_ref, wbig_ref, wfc_ref, bfc_ref, out_ref, *,
                seq, batch, hidden):
    H = hidden
    G = 4 * H
    B = batch

    # ----- hoisted constants (one vreg each, built once) --------------------
    lane = jax.lax.broadcasted_iota(jnp.int32, (B, G), 1)
    is_g = (lane >= 2 * H) & (lane < 3 * H)        # tanh ("g") gate block
    m_blk1 = (lane >= H) & (lane < 2 * H)          # block 1 (f position)
    m_blk3 = lane >= 3 * H                         # block 3 (true h position)
    m_one = lane == 0                              # bias lane of fused matmul
    act_scale = jnp.where(is_g, 1.0, 0.5).astype(jnp.float32)

    # Layer-0 input projection for the WHOLE sequence (input_size == 1):
    # pure VPU broadcast multiply, b0 folded in.  xp[t] is step t's gates'
    # input contribution on all 4 gate blocks.
    xp = x_ref[...] * wx_ref[...] + b0_ref[...]    # (S, B, 4H) f32

    def cell(z, c):
        # One LSTM cell over a full 128-lane gate tile, gates [ i | f | g | o ].
        #   * single tanh per tile: sigmoid(x) = 0.5*tanh(x/2) + 0.5
        #   * only direction-independent rolls: 2H block rolls, and an H roll
        #     of a value already replicated 2H apart (lands the same either way)
        # `c` holds the true cell state replicated at blocks 1 and 3; the
        # returned h holds the true hidden state at block 3.  Junk lanes stay
        # bounded and are annihilated by zero weight rows downstream.
        t = jnp.tanh(z * act_scale)                 # one EUP pass
        a = jnp.where(is_g, t, 0.5 * t + 0.5)       # [ i | f | g | o ]
        r = pltpu.roll(a, 2 * H, axis=1)            # [ g | o | i | f ]
        ig = a * r                                  # i*g at blocks 0 and 2
        f_rep = jnp.where(m_blk1, a, r)             # f   at blocks 1 and 3
        c_new = pltpu.roll(ig, H, axis=1) + f_rep * c   # i*g + f*c at blocks 1,3
        h = a * jnp.tanh(c_new)                     # o*tanh(c_new) at block 3
        return h, c_new

    zeros = jnp.zeros((B, G), jnp.float32)
    c1, c2, h2 = zeros, zeros, zeros
    g0_rec = None                                   # h1(t-1) @ Whh0 (t>0 only)

    # Fully unrolled, skewed recurrence: one fused matmul per step.
    for k in range(seq):
        # --- layer-0 cell, step k -------------------------------------------
        z0 = xp[k] if g0_rec is None else xp[k] + g0_rec
        h1, c1 = cell(z0, c1)

        # --- fused N=256 MXU pass --------------------------------------------
        # operand: lane0 = 1.0 (bias), block1 = h2(k-1), block3 = h1(k),
        # all other lanes junk -> multiplied by all-zero weight rows.
        peer = jnp.where(m_one, 1.0, pltpu.roll(h2, 2 * H, axis=1))
        h_comb = jnp.where(m_blk3, h1, peer).astype(jnp.bfloat16)
        gg = jnp.dot(h_comb, wbig_ref[...], preferred_element_type=jnp.float32)
        g0_rec = gg[:, :G]                          # h1(k) @ Whh0  (for step k+1)

        # --- layer-1 cell, step k -------------------------------------------
        h2, c2 = cell(gg[:, G:], c2)                # b1 + h1@Wih1 + h2@Whh1

    # Final Linear on the last step's layer-1 hidden state.  wfc rows outside
    # [3H,4H) are zero, so h2's junk lanes contribute nothing.
    out_ref[...] = (jnp.dot(h2.astype(jnp.bfloat16), wfc_ref[...],
                            preferred_element_type=jnp.float32) + bfc_ref[...])


# ---------------------------------------------------------------------------
# Wrapper: packs weights into the kernel layout (layout plumbing only) and
# launches one grid-less pallas_call.
# ---------------------------------------------------------------------------
@jax.jit
def lstm_model_forward(x, params):
    """x: (batch, seq, input_size) float32 — PyTorch batch_first layout."""
    B, S, I = x.shape
    H = params["w_hh_l0"].shape[1]
    O = params["fc_w"].shape[0]
    G = 4 * H
    assert I == 1, "kernel specialises the input projection for input_size == 1"

    f32, bf16 = jnp.float32, jnp.bfloat16

    # Layer-0 input projection as a broadcast row (VPU path), biases folded.
    wx = params["w_ih_l0"].astype(f32).reshape(1, 1, G)             # (1,1,4H)
    b0 = (params["b_ih_l0"] + params["b_hh_l0"]).astype(f32).reshape(1, 1, G)

    # Fused recurrent weight (K-packed, N-stacked), bf16 -> one MXU pass:
    #   columns [0,4H)  : layer-0 recurrent gates   <- h1   (rows 3H:4H)
    #   columns [4H,8H) : layer-1 gates             <- bias (row 0),
    #                      h2 (rows H:2H), h1 (rows 3H:4H)
    # Every other row is exactly zero so junk lanes of the packed operand
    # contribute nothing.
    wbig = jnp.zeros((G, 2 * G), f32)
    wbig = wbig.at[3 * H:, :G].set(params["w_hh_l0"].astype(f32).T)
    wbig = wbig.at[0, G:].set((params["b_ih_l1"] + params["b_hh_l1"]).astype(f32))
    wbig = wbig.at[H:2 * H, G:].set(params["w_hh_l1"].astype(f32).T)
    wbig = wbig.at[3 * H:, G:].set(params["w_ih_l1"].astype(f32).T)

    wfc = jnp.zeros((G, O), f32).at[3 * H:, :].set(params["fc_w"].astype(f32).T)
    bfc = params["fc_b"].astype(f32).reshape(1, O)

    x_tm = jnp.transpose(x, (1, 0, 2)).astype(f32)                  # (S, B, 1)

    kernel = functools.partial(lstm_kernel, seq=S, batch=B, hidden=H)
    vmem = pl.BlockSpec(memory_space=pltpu.MemorySpace.VMEM)
    return pl.pallas_call(
        kernel,
        out_shape=jax.ShapeDtypeStruct((B, O), f32),
        in_specs=[vmem] * 6,
        out_specs=vmem,
    )(x_tm, wx, b0, wbig.astype(bf16), wfc.astype(bf16), bfc)


# ---------------------------------------------------------------------------
# Deterministic PyTorch-style parameter init (U(-1/sqrt(H), 1/sqrt(H))),
# stored in PyTorch shapes.
# ---------------------------------------------------------------------------
def init_params(key, input_size, hidden_size, output_size):
    H, I, O = hidden_size, input_size, output_size
    bound = 1.0 / (H ** 0.5)
    ks = jax.random.split(key, 10)
    u = lambda k, shape: jax.random.uniform(k, shape, jnp.float32, -bound, bound)
    return {
        "w_ih_l0": u(ks[0], (4 * H, I)), "w_hh_l0": u(ks[1], (4 * H, H)),
        "b_ih_l0": u(ks[2], (4 * H,)),   "b_hh_l0": u(ks[3], (4 * H,)),
        "w_ih_l1": u(ks[4], (4 * H, H)), "w_hh_l1": u(ks[5], (4 * H, H)),
        "b_ih_l1": u(ks[6], (4 * H,)),   "b_hh_l1": u(ks[7], (4 * H,)),
        "fc_w":    u(ks[8], (O, H)),     "fc_b":    u(ks[9], (O,)),
    }


# Pure-JAX f32 reference (mirrors torch.nn.LSTM(num_layers=2) + Linear).
def reference_forward(x, params):
    B, S, _ = x.shape
    H = params["w_hh_l0"].shape[1]

    def cell(x_in, h, c, w_ih, w_hh, b_ih, b_hh):
        g = x_in @ w_ih.T + h @ w_hh.T + b_ih + b_hh
        i = jax.nn.sigmoid(g[:, 0 * H:1 * H])
        f = jax.nn.sigmoid(g[:, 1 * H:2 * H])
        gg = jnp.tanh(g[:, 2 * H:3 * H])
        o = jax.nn.sigmoid(g[:, 3 * H:4 * H])
        c = f * c + i * gg
        h = o * jnp.tanh(c)
        return h, c

    h1 = c1 = h2 = c2 = jnp.zeros((B, H), jnp.float32)
    for t in range(S):
        h1, c1 = cell(x[:, t, :], h1, c1, params["w_ih_l0"], params["w_hh_l0"],
                      params["b_ih_l0"], params["b_hh_l0"])
        h2, c2 = cell(h1, h2, c2, params["w_ih_l1"], params["w_hh_l1"],
                      params["b_ih_l1"], params["b_hh_l1"])
    return h2 @ params["fc_w"].T + params["fc_b"]


if __name__ == "__main__":
    # Small shapes consistent with the module's forward:
    # batch=2, seq=8, input_size=1, hidden_size=32, num_layers=2, output_size=1
    B, S, I, H, O = 2, 8, 1, 32, 1

    key = jax.random.PRNGKey(0)
    k_x, k_p = jax.random.split(key)
    x = jax.random.normal(k_x, (B, S, I), jnp.float32)
    params = init_params(k_p, I, H, O)

    out = jax.block_until_ready(lstm_model_forward(x, params))
    ref = reference_forward(x, params)

    assert out.shape == (B, O), out.shape
    # bf16 MXU operands (f32 accumulation) -> tolerance loosened vs f32 reference,
    # per the performance review; structural errors would be orders larger.
    assert jnp.allclose(out, ref, atol=2e-2, rtol=2e-2), (out, ref)

    print("KERNEL_OK")
</pallas_src>

<mosaic_0001>
module attributes {stable_mosaic.version = 11 : i64} {
  func.func @lstm_kernel(%arg0: memref<8x2x1xf32, #tpu.memory_space<vmem>>, %arg1: memref<1x1x128xf32, #tpu.memory_space<vmem>>, %arg2: memref<1x1x128xf32, #tpu.memory_space<vmem>>, %arg3: memref<128x256xbf16, #tpu.memory_space<vmem>>, %arg4: memref<128x1xbf16, #tpu.memory_space<vmem>>, %arg5: memref<1x1xf32, #tpu.memory_space<vmem>>, %arg6: memref<2x1xf32, #tpu.memory_space<vmem>>) attributes {dimension_semantics = [], scalar_prefetch = 0 : i64, scratch_operands = 0 : i64, tpu.core_type = #tpu.core_type<tc>} {
    %0 = tpu.iota {dimensions = array<i32: 1>} : vector<2x128xi32>
    %c64_i32 = arith.constant 64 : i32
    %1 = vector.broadcast %c64_i32 : i32 to vector<2x128xi32>
    %2 = arith.cmpi sge, %0, %1 : vector<2x128xi32>
    %c96_i32 = arith.constant 96 : i32
    %3 = vector.broadcast %c96_i32 : i32 to vector<2x128xi32>
    %4 = arith.cmpi slt, %0, %3 : vector<2x128xi32>
    %5 = arith.andi %2, %4 : vector<2x128xi1>
    %c32_i32 = arith.constant 32 : i32
    %6 = vector.broadcast %c32_i32 : i32 to vector<2x128xi32>
    %7 = arith.cmpi sge, %0, %6 : vector<2x128xi32>
    %c64_i32_0 = arith.constant 64 : i32
    %8 = vector.broadcast %c64_i32_0 : i32 to vector<2x128xi32>
    %9 = arith.cmpi slt, %0, %8 : vector<2x128xi32>
    %10 = arith.andi %7, %9 : vector<2x128xi1>
    %c96_i32_1 = arith.constant 96 : i32
    %11 = vector.broadcast %c96_i32_1 : i32 to vector<2x128xi32>
    %12 = arith.cmpi sge, %0, %11 : vector<2x128xi32>
    %c0_i32 = arith.constant 0 : i32
    %13 = vector.broadcast %c0_i32 : i32 to vector<2x128xi32>
    %14 = arith.cmpi eq, %0, %13 : vector<2x128xi32>
    %cst = arith.constant 1.000000e+00 : f32
    %cst_2 = arith.constant 5.000000e-01 : f32
    %15 = vector.broadcast %cst : f32 to vector<2x128xf32>
    %16 = vector.broadcast %cst_2 : f32 to vector<2x128xf32>
    %17 = arith.select %5, %15, %16 : vector<2x128xi1>, vector<2x128xf32>
    %c0 = arith.constant 0 : index
    %c0_3 = arith.constant 0 : index
    %c0_4 = arith.constant 0 : index
    %18 = vector.load %arg0[%c0, %c0_3, %c0_4] : memref<8x2x1xf32, #tpu.memory_space<vmem>>, vector<8x2x1xf32>
    %c0_5 = arith.constant 0 : index
    %c0_6 = arith.constant 0 : index
    %c0_7 = arith.constant 0 : index
    %19 = vector.load %arg1[%c0_5, %c0_6, %c0_7] : memref<1x1x128xf32, #tpu.memory_space<vmem>>, vector<1x1x128xf32>
    %20 = vector.broadcast %18 : vector<8x2x1xf32> to vector<8x2x128xf32>
    %21 = vector.broadcast %19 : vector<1x1x128xf32> to vector<8x2x128xf32>
    %22 = arith.mulf %20, %21 : vector<8x2x128xf32>
    %c0_8 = arith.constant 0 : index
    %c0_9 = arith.constant 0 : index
    %c0_10 = arith.constant 0 : index
    %23 = vector.load %arg2[%c0_8, %c0_9, %c0_10] : memref<1x1x128xf32, #tpu.memory_space<vmem>>, vector<1x1x128xf32>
    %24 = vector.broadcast %23 : vector<1x1x128xf32> to vector<8x2x128xf32>
    %25 = arith.addf %22, %24 : vector<8x2x128xf32>
    %cst_11 = arith.constant 0.000000e+00 : f32
    %26 = vector.broadcast %cst_11 : f32 to vector<2x128xf32>
    %27 = vector.extract_strided_slice %25 {offsets = [0, 0, 0], sizes = [1, 2, 128], strides = [1, 1, 1]} : vector<8x2x128xf32> to vector<1x2x128xf32>
    %28 = vector.shape_cast %27 : vector<1x2x128xf32> to vector<2x128xf32>
    %29 = arith.mulf %28, %17 : vector<2x128xf32>
    %30 = math.tanh %29 : vector<2x128xf32>
    %cst_12 = arith.constant 5.000000e-01 : f32
    %31 = vector.broadcast %cst_12 : f32 to vector<2x128xf32>
    %32 = arith.mulf %31, %30 : vector<2x128xf32>
    %cst_13 = arith.constant 5.000000e-01 : f32
    %33 = vector.broadcast %cst_13 : f32 to vector<2x128xf32>
    %34 = arith.addf %32, %33 : vector<2x128xf32>
    %35 = arith.select %5, %30, %34 : vector<2x128xi1>, vector<2x128xf32>
    %c64_i32_14 = arith.constant 64 : i32
    %36 = tpu.dynamic_rotate %35 by %c64_i32_14 dim 1 : vector<2x128xf32>, i32 -> vector<2x128xf32>
    %37 = arith.mulf %35, %36 : vector<2x128xf32>
    %38 = arith.select %10, %35, %36 : vector<2x128xi1>, vector<2x128xf32>
    %c32_i32_15 = arith.constant 32 : i32
    %39 = tpu.dynamic_rotate %37 by %c32_i32_15 dim 1 : vector<2x128xf32>, i32 -> vector<2x128xf32>
    %40 = arith.mulf %38, %26 : vector<2x128xf32>
    %41 = arith.addf %39, %40 : vector<2x128xf32>
    %42 = math.tanh %41 : vector<2x128xf32>
    %43 = arith.mulf %35, %42 : vector<2x128xf32>
    %c64_i32_16 = arith.constant 64 : i32
    %44 = tpu.dynamic_rotate %26 by %c64_i32_16 dim 1 : vector<2x128xf32>, i32 -> vector<2x128xf32>
    %cst_17 = arith.constant 1.000000e+00 : f32
    %45 = vector.broadcast %cst_17 : f32 to vector<2x128xf32>
    %46 = arith.select %14, %45, %44 : vector<2x128xi1>, vector<2x128xf32>
    %47 = arith.select %12, %43, %46 : vector<2x128xi1>, vector<2x128xf32>
    %48 = arith.truncf %47 : vector<2x128xf32> to vector<2x128xbf16>
    %c0_18 = arith.constant 0 : index
    %c0_19 = arith.constant 0 : index
    %49 = vector.load %arg3[%c0_18, %c0_19] : memref<128x256xbf16, #tpu.memory_space<vmem>>, vector<128x256xbf16>
    %cst_20 = arith.constant dense<0.000000e+00> : vector<2x256xf32>
    %50 = tpu.matmul %48, %49, %cst_20 {dimension_numbers = #tpu.dot_dimension_numbers<[1], [0], [0], [1], [0, 0, 1, 1], [], []>} : vector<2x128xbf16>, vector<128x256xbf16>, vector<2x256xf32> -> vector<2x256xf32>
    %51 = vector.extract_strided_slice %50 {offsets = [0, 0], sizes = [2, 128], strides = [1, 1]} : vector<2x256xf32> to vector<2x128xf32>
    %52 = vector.extract_strided_slice %50 {offsets = [0, 128], sizes = [2, 128], strides = [1, 1]} : vector<2x256xf32> to vector<2x128xf32>
    %53 = arith.mulf %52, %17 : vector<2x128xf32>
    %54 = math.tanh %53 : vector<2x128xf32>
    %cst_21 = arith.constant 5.000000e-01 : f32
    %55 = vector.broadcast %cst_21 : f32 to vector<2x128xf32>
    %56 = arith.mulf %55, %54 : vector<2x128xf32>
    %cst_22 = arith.constant 5.000000e-01 : f32
    %57 = vector.broadcast %cst_22 : f32 to vector<2x128xf32>
    %58 = arith.addf %56, %57 : vector<2x128xf32>
    %59 = arith.select %5, %54, %58 : vector<2x128xi1>, vector<2x128xf32>
    %c64_i32_23 = arith.constant 64 : i32
    %60 = tpu.dynamic_rotate %59 by %c64_i32_23 dim 1 : vector<2x128xf32>, i32 -> vector<2x128xf32>
    %61 = arith.mulf %59, %60 : vector<2x128xf32>
    %62 = arith.select %10, %59, %60 : vector<2x128xi1>, vector<2x128xf32>
    %c32_i32_24 = arith.constant 32 : i32
    %63 = tpu.dynamic_rotate %61 by %c32_i32_24 dim 1 : vector<2x128xf32>, i32 -> vector<2x128xf32>
    %64 = arith.mulf %62, %26 : vector<2x128xf32>
    %65 = arith.addf %63, %64 : vector<2x128xf32>
    %66 = math.tanh %65 : vector<2x128xf32>
    %67 = arith.mulf %59, %66 : vector<2x128xf32>
    %68 = vector.extract_strided_slice %25 {offsets = [1, 0, 0], sizes = [1, 2, 128], strides = [1, 1, 1]} : vector<8x2x128xf32> to vector<1x2x128xf32>
    %69 = vector.shape_cast %68 : vector<1x2x128xf32> to vector<2x128xf32>
    %70 = arith.addf %69, %51 : vector<2x128xf32>
    %71 = arith.mulf %70, %17 : vector<2x128xf32>
    %72 = math.tanh %71 : vector<2x128xf32>
    %cst_25 = arith.constant 5.000000e-01 : f32
    %73 = vector.broadcast %cst_25 : f32 to vector<2x128xf32>
    %74 = arith.mulf %73, %72 : vector<2x128xf32>
    %cst_26 = arith.constant 5.000000e-01 : f32
    %75 = vector.broadcast %cst_26 : f32 to vector<2x128xf32>
    %76 = arith.addf %74, %75 : vector<2x128xf32>
    %77 = arith.select %5, %72, %76 : vector<2x128xi1>, vector<2x128xf32>
    %c64_i32_27 = arith.constant 64 : i32
    %78 = tpu.dynamic_rotate %77 by %c64_i32_27 dim 1 : vector<2x128xf32>, i32 -> vector<2x128xf32>
    %79 = arith.mulf %77, %78 : vector<2x128xf32>
    %80 = arith.select %10, %77, %78 : vector<2x128xi1>, vector<2x128xf32>
    %c32_i32_28 = arith.constant 32 : i32
    %81 = tpu.dynamic_rotate %79 by %c32_i32_28 dim 1 : vector<2x128xf32>, i32 -> vector<2x128xf32>
    %82 = arith.mulf %80, %41 : vector<2x128xf32>
    %83 = arith.addf %81, %82 : vector<2x128xf32>
    %84 = math.tanh %83 : vector<2x128xf32>
    %85 = arith.mulf %77, %84 : vector<2x128xf32>
    %c64_i32_29 = arith.constant 64 : i32
    %86 = tpu.dynamic_rotate %67 by %c64_i32_29 dim 1 : vector<2x128xf32>, i32 -> vector<2x128xf32>
    %cst_30 = arith.constant 1.000000e+00 : f32
    %87 = vector.broadcast %cst_30 : f32 to vector<2x128xf32>
    %88 = arith.select %14, %87, %86 : vector<2x128xi1>, vector<2x128xf32>
    %89 = arith.select %12, %85, %88 : vector<2x128xi1>, vector<2x128xf32>
    %90 = arith.truncf %89 : vector<2x128xf32> to vector<2x128xbf16>
    %c0_31 = arith.constant 0 : index
    %c0_32 = arith.constant 0 : index
    %91 = vector.load %arg3[%c0_31, %c0_32] : memref<128x256xbf16, #tpu.memory_space<vmem>>, vector<128x256xbf16>
    %cst_33 = arith.constant dense<0.000000e+00> : vector<2x256xf32>
    %92 = tpu.matmul %90, %91, %cst_33 {dimension_numbers = #tpu.dot_dimension_numbers<[1], [0], [0], [1], [0, 0, 1, 1], [], []>} : vector<2x128xbf16>, vector<128x256xbf16>, vector<2x256xf32> -> vector<2x256xf32>
    %93 = vector.extract_strided_slice %92 {offsets = [0, 0], sizes = [2, 128], strides = [1, 1]} : vector<2x256xf32> to vector<2x128xf32>
    %94 = vector.extract_strided_slice %92 {offsets = [0, 128], sizes = [2, 128], strides = [1, 1]} : vector<2x256xf32> to vector<2x128xf32>
    %95 = arith.mulf %94, %17 : vector<2x128xf32>
    %96 = math.tanh %95 : vector<2x128xf32>
    %cst_34 = arith.constant 5.000000e-01 : f32
    %97 = vector.broadcast %cst_34 : f32 to vector<2x128xf32>
    %98 = arith.mulf %97, %96 : vector<2x128xf32>
    %cst_35 = arith.constant 5.000000e-01 : f32
    %99 = vector.broadcast %cst_35 : f32 to vector<2x128xf32>
    %100 = arith.addf %98, %99 : vector<2x128xf32>
    %101 = arith.select %5, %96, %100 : vector<2x128xi1>, vector<2x128xf32>
    %c64_i32_36 = arith.constant 64 : i32
    %102 = tpu.dynamic_rotate %101 by %c64_i32_36 dim 1 : vector<2x128xf32>, i32 -> vector<2x128xf32>
    %103 = arith.mulf %101, %102 : vector<2x128xf32>
    %104 = arith.select %10, %101, %102 : vector<2x128xi1>, vector<2x128xf32>
    %c32_i32_37 = arith.constant 32 : i32
    %105 = tpu.dynamic_rotate %103 by %c32_i32_37 dim 1 : vector<2x128xf32>, i32 -> vector<2x128xf32>
    %106 = arith.mulf %104, %65 : vector<2x128xf32>
    %107 = arith.addf %105, %106 : vector<2x128xf32>
    %108 = math.tanh %107 : vector<2x128xf32>
    %109 = arith.mulf %101, %108 : vector<2x128xf32>
    %110 = vector.extract_strided_slice %25 {offsets = [2, 0, 0], sizes = [1, 2, 128], strides = [1, 1, 1]} : vector<8x2x128xf32> to vector<1x2x128xf32>
    %111 = vector.shape_cast %110 : vector<1x2x128xf32> to vector<2x128xf32>
    %112 = arith.addf %111, %93 : vector<2x128xf32>
    %113 = arith.mulf %112, %17 : vector<2x128xf32>
    %114 = math.tanh %113 : vector<2x128xf32>
    %cst_38 = arith.constant 5.000000e-01 : f32
    %115 = vector.broadcast %cst_38 : f32 to vector<2x128xf32>
    %116 = arith.mulf %115, %114 : vector<2x128xf32>
    %cst_39 = arith.constant 5.000000e-01 : f32
    %117 = vector.broadcast %cst_39 : f32 to vector<2x128xf32>
    %118 = arith.addf %116, %117 : vector<2x128xf32>
    %119 = arith.select %5, %114, %118 : vector<2x128xi1>, vector<2x128xf32>
    %c64_i32_40 = arith.constant 64 : i32
    %120 = tpu.dynamic_rotate %119 by %c64_i32_40 dim 1 : vector<2x128xf32>, i32 -> vector<2x128xf32>
    %121 = arith.mulf %119, %120 : vector<2x128xf32>
    %122 = arith.select %10, %119, %120 : vector<2x128xi1>, vector<2x128xf32>
    %c32_i32_41 = arith.constant 32 : i32
    %123 = tpu.dynamic_rotate %121 by %c32_i32_41 dim 1 : vector<2x128xf32>, i32 -> vector<2x128xf32>
    %124 = arith.mulf %122, %83 : vector<2x128xf32>
    %125 = arith.addf %123, %124 : vector<2x128xf32>
    %126 = math.tanh %125 : vector<2x128xf32>
    %127 = arith.mulf %119, %126 : vector<2x128xf32>
    %c64_i32_42 = arith.constant 64 : i32
    %128 = tpu.dynamic_rotate %109 by %c64_i32_42 dim 1 : vector<2x128xf32>, i32 -> vector<2x128xf32>
    %cst_43 = arith.constant 1.000000e+00 : f32
    %129 = vector.broadcast %cst_43 : f32 to vector<2x128xf32>
    %130 = arith.select %14, %129, %128 : vector<2x128xi1>, vector<2x128xf32>
    %131 = arith.select %12, %127, %130 : vector<2x128xi1>, vector<2x128xf32>
    %132 = arith.truncf %131 : vector<2x128xf32> to vector<2x128xbf16>
    %c0_44 = arith.constant 0 : index
    %c0_45 = arith.constant 0 : index
    %133 = vector.load %arg3[%c0_44, %c0_45] : memref<128x256xbf16, #tpu.memory_space<vmem>>, vector<128x256xbf16>
    %cst_46 = arith.constant dense<0.000000e+00> : vector<2x256xf32>
    %134 = tpu.matmul %132, %133, %cst_46 {dimension_numbers = #tpu.dot_dimension_numbers<[1], [0], [0], [1], [0, 0, 1, 1], [], []>} : vector<2x128xbf16>, vector<128x256xbf16>, vector<2x256xf32> -> vector<2x256xf32>
    %135 = vector.extract_strided_slice %134 {offsets = [0, 0], sizes = [2, 128], strides = [1, 1]} : vector<2x256xf32> to vector<2x128xf32>
    %136 = vector.extract_strided_slice %134 {offsets = [0, 128], sizes = [2, 128], strides = [1, 1]} : vector<2x256xf32> to vector<2x128xf32>
    %137 = arith.mulf %136, %17 : vector<2x128xf32>
    %138 = math.tanh %137 : vector<2x128xf32>
    %cst_47 = arith.constant 5.000000e-01 : f32
    %139 = vector.broadcast %cst_47 : f32 to vector<2x128xf32>
    %140 = arith.mulf %139, %138 : vector<2x128xf32>
    %cst_48 = arith.constant 5.000000e-01 : f32
    %141 = vector.broadcast %cst_48 : f32 to vector<2x128xf32>
    %142 = arith.addf %140, %141 : vector<2x128xf32>
    %143 = arith.select %5, %138, %142 : vector<2x128xi1>, vector<2x128xf32>
    %c64_i32_49 = arith.constant 64 : i32
    %144 = tpu.dynamic_rotate %143 by %c64_i32_49 dim 1 : vector<2x128xf32>, i32 -> vector<2x128xf32>
    %145 = arith.mulf %143, %144 : vector<2x128xf32>
    %146 = arith.select %10, %143, %144 : vector<2x128xi1>, vector<2x128xf32>
    %c32_i32_50 = arith.constant 32 : i32
    %147 = tpu.dynamic_rotate %145 by %c32_i32_50 dim 1 : vector<2x128xf32>, i32 -> vector<2x128xf32>
    %148 = arith.mulf %146, %107 : vector<2x128xf32>
    %149 = arith.addf %147, %148 : vector<2x128xf32>
    %150 = math.tanh %149 : vector<2x128xf32>
    %151 = arith.mulf %143, %150 : vector<2x128xf32>
    %152 = vector.extract_strided_slice %25 {offsets = [3, 0, 0], sizes = [1, 2, 128], strides = [1, 1, 1]} : vector<8x2x128xf32> to vector<1x2x128xf32>
    %153 = vector.shape_cast %152 : vector<1x2x128xf32> to vector<2x128xf32>
    %154 = arith.addf %153, %135 : vector<2x128xf32>
    %155 = arith.mulf %154, %17 : vector<2x128xf32>
    %156 = math.tanh %155 : vector<2x128xf32>
    %cst_51 = arith.constant 5.000000e-01 : f32
    %157 = vector.broadcast %cst_51 : f32 to vector<2x128xf32>
    %158 = arith.mulf %157, %156 : vector<2x128xf32>
    %cst_52 = arith.constant 5.000000e-01 : f32
    %159 = vector.broadcast %cst_52 : f32 to vector<2x128xf32>
    %160 = arith.addf %158, %159 : vector<2x128xf32>
    %161 = arith.select %5, %156, %160 : vector<2x128xi1>, vector<2x128xf32>
    %c64_i32_53 = arith.constant 64 : i32
    %162 = tpu.dynamic_rotate %161 by %c64_i32_53 dim 1 : vector<2x128xf32>, i32 -> vector<2x128xf32>
    %163 = arith.mulf %161, %162 : vector<2x128xf32>
    %164 = arith.select %10, %161, %162 : vector<2x128xi1>, vector<2x128xf32>
    %c32_i32_54 = arith.constant 32 : i32
    %165 = tpu.dynamic_rotate %163 by %c32_i32_54 dim 1 : vector<2x128xf32>, i32 -> vector<2x128xf32>
    %166 = arith.mulf %164, %125 : vector<2x128xf32>
    %167 = arith.addf %165, %166 : vector<2x128xf32>
    %168 = math.tanh %167 : vector<2x128xf32>
    %169 = arith.mulf %161, %168 : vector<2x128xf32>
    %c64_i32_55 = arith.constant 64 : i32
    %170 = tpu.dynamic_rotate %151 by %c64_i32_55 dim 1 : vector<2x128xf32>, i32 -> vector<2x128xf32>
    %cst_56 = arith.constant 1.000000e+00 : f32
    %171 = vector.broadcast %cst_56 : f32 to vector<2x128xf32>
    %172 = arith.select %14, %171, %170 : vector<2x128xi1>, vector<2x128xf32>
    %173 = arith.select %12, %169, %172 : vector<2x128xi1>, vector<2x128xf32>
    %174 = arith.truncf %173 : vector<2x128xf32> to vector<2x128xbf16>
    %c0_57 = arith.constant 0 : index
    %c0_58 = arith.constant 0 : index
    %175 = vector.load %arg3[%c0_57, %c0_58] : memref<128x256xbf16, #tpu.memory_space<vmem>>, vector<128x256xbf16>
    %cst_59 = arith.constant dense<0.000000e+00> : vector<2x256xf32>
    %176 = tpu.matmul %174, %175, %cst_59 {dimension_numbers = #tpu.dot_dimension_numbers<[1], [0], [0], [1], [0, 0, 1, 1], [], []>} : vector<2x128xbf16>, vector<128x256xbf16>, vector<2x256xf32> -> vector<2x256xf32>
    %177 = vector.extract_strided_slice %176 {offsets = [0, 0], sizes = [2, 128], strides = [1, 1]} : vector<2x256xf32> to vector<2x128xf32>
    %178 = vector.extract_strided_slice %176 {offsets = [0, 128], sizes = [2, 128], strides = [1, 1]} : vector<2x256xf32> to vector<2x128xf32>
    %179 = arith.mulf %178, %17 : vector<2x128xf32>
    %180 = math.tanh %179 : vector<2x128xf32>
    %cst_60 = arith.constant 5.000000e-01 : f32
    %181 = vector.broadcast %cst_60 : f32 to vector<2x128xf32>
    %182 = arith.mulf %181, %180 : vector<2x128xf32>
    %cst_61 = arith.constant 5.000000e-01 : f32
    %183 = vector.broadcast %cst_61 : f32 to vector<2x128xf32>
    %184 = arith.addf %182, %183 : vector<2x128xf32>
    %185 = arith.select %5, %180, %184 : vector<2x128xi1>, vector<2x128xf32>
    %c64_i32_62 = arith.constant 64 : i32
    %186 = tpu.dynamic_rotate %185 by %c64_i32_62 dim 1 : vector<2x128xf32>, i32 -> vector<2x128xf32>
    %187 = arith.mulf %185, %186 : vector<2x128xf32>
    %188 = arith.select %10, %185, %186 : vector<2x128xi1>, vector<2x128xf32>
    %c32_i32_63 = arith.constant 32 : i32
    %189 = tpu.dynamic_rotate %187 by %c32_i32_63 dim 1 : vector<2x128xf32>, i32 -> vector<2x128xf32>
    %190 = arith.mulf %188, %149 : vector<2x128xf32>
    %191 = arith.addf %189, %190 : vector<2x128xf32>
    %192 = math.tanh %191 : vector<2x128xf32>
    %193 = arith.mulf %185, %192 : vector<2x128xf32>
    %194 = vector.extract_strided_slice %25 {offsets = [4, 0, 0], sizes = [1, 2, 128], strides = [1, 1, 1]} : vector<8x2x128xf32> to vector<1x2x128xf32>
    %195 = vector.shape_cast %194 : vector<1x2x128xf32> to vector<2x128xf32>
    %196 = arith.addf %195, %177 : vector<2x128xf32>
    %197 = arith.mulf %196, %17 : vector<2x128xf32>
    %198 = math.tanh %197 : vector<2x128xf32>
    %cst_64 = arith.constant 5.000000e-01 : f32
    %199 = vector.broadcast %cst_64 : f32 to vector<2x128xf32>
    %200 = arith.mulf %199, %198 : vector<2x128xf32>
    %cst_65 = arith.constant 5.000000e-01 : f32
    %201 = vector.broadcast %cst_65 : f32 to vector<2x128xf32>
    %202 = arith.addf %200, %201 : vector<2x128xf32>
    %203 = arith.select %5, %198, %202 : vector<2x128xi1>, vector<2x128xf32>
    %c64_i32_66 = arith.constant 64 : i32
    %204 = tpu.dynamic_rotate %203 by %c64_i32_66 dim 1 : vector<2x128xf32>, i32 -> vector<2x128xf32>
    %205 = arith.mulf %203, %204 : vector<2x128xf32>
    %206 = arith.select %10, %203, %204 : vector<2x128xi1>, vector<2x128xf32>
    %c32_i32_67 = arith.constant 32 : i32
    %207 = tpu.dynamic_rotate %205 by %c32_i32_67 dim 1 : vector<2x128xf32>, i32 -> vector<2x128xf32>
    %208 = arith.mulf %206, %167 : vector<2x128xf32>
    %209 = arith.addf %207, %208 : vector<2x128xf32>
    %210 = math.tanh %209 : vector<2x128xf32>
    %211 = arith.mulf %203, %210 : vector<2x128xf32>
    %c64_i32_68 = arith.constant 64 : i32
    %212 = tpu.dynamic_rotate %193 by %c64_i32_68 dim 1 : vector<2x128xf32>, i32 -> vector<2x128xf32>
    %cst_69 = arith.constant 1.000000e+00 : f32
    %213 = vector.broadcast %cst_69 : f32 to vector<2x128xf32>
    %214 = arith.select %14, %213, %212 : vector<2x128xi1>, vector<2x128xf32>
    %215 = arith.select %12, %211, %214 : vector<2x128xi1>, vector<2x128xf32>
    %216 = arith.truncf %215 : vector<2x128xf32> to vector<2x128xbf16>
    %c0_70 = arith.constant 0 : index
    %c0_71 = arith.constant 0 : index
    %217 = vector.load %arg3[%c0_70, %c0_71] : memref<128x256xbf16, #tpu.memory_space<vmem>>, vector<128x256xbf16>
    %cst_72 = arith.constant dense<0.000000e+00> : vector<2x256xf32>
    %218 = tpu.matmul %216, %217, %cst_72 {dimension_numbers = #tpu.dot_dimension_numbers<[1], [0], [0], [1], [0, 0, 1, 1], [], []>} : vector<2x128xbf16>, vector<128x256xbf16>, vector<2x256xf32> -> vector<2x256xf32>
    %219 = vector.extract_strided_slice %218 {offsets = [0, 0], sizes = [2, 128], strides = [1, 1]} : vector<2x256xf32> to vector<2x128xf32>
    %220 = vector.extract_strided_slice %218 {offsets = [0, 128], sizes = [2, 128], strides = [1, 1]} : vector<2x256xf32> to vector<2x128xf32>
    %221 = arith.mulf %220, %17 : vector<2x128xf32>
    %222 = math.tanh %221 : vector<2x128xf32>
    %cst_73 = arith.constant 5.000000e-01 : f32
    %223 = vector.broadcast %cst_73 : f32 to vector<2x128xf32>
    %224 = arith.mulf %223, %222 : vector<2x128xf32>
    %cst_74 = arith.constant 5.000000e-01 : f32
    %225 = vector.broadcast %cst_74 : f32 to vector<2x128xf32>
    %226 = arith.addf %224, %225 : vector<2x128xf32>
    %227 = arith.select %5, %222, %226 : vector<2x128xi1>, vector<2x128xf32>
    %c64_i32_75 = arith.constant 64 : i32
    %228 = tpu.dynamic_rotate %227 by %c64_i32_75 dim 1 : vector<2x128xf32>, i32 -> vector<2x128xf32>
    %229 = arith.mulf %227, %228 : vector<2x128xf32>
    %230 = arith.select %10, %227, %228 : vector<2x128xi1>, vector<2x128xf32>
    %c32_i32_76 = arith.constant 32 : i32
    %231 = tpu.dynamic_rotate %229 by %c32_i32_76 dim 1 : vector<2x128xf32>, i32 -> vector<2x128xf32>
    %232 = arith.mulf %230, %191 : vector<2x128xf32>
    %233 = arith.addf %231, %232 : vector<2x128xf32>
    %234 = math.tanh %233 : vector<2x128xf32>
    %235 = arith.mulf %227, %234 : vector<2x128xf32>
    %236 = vector.extract_strided_slice %25 {offsets = [5, 0, 0], sizes = [1, 2, 128], strides = [1, 1, 1]} : vector<8x2x128xf32> to vector<1x2x128xf32>
    %237 = vector.shape_cast %236 : vector<1x2x128xf32> to vector<2x128xf32>
    %238 = arith.addf %237, %219 : vector<2x128xf32>
    %239 = arith.mulf %238, %17 : vector<2x128xf32>
    %240 = math.tanh %239 : vector<2x128xf32>
    %cst_77 = arith.constant 5.000000e-01 : f32
    %241 = vector.broadcast %cst_77 : f32 to vector<2x128xf32>
    %242 = arith.mulf %241, %240 : vector<2x128xf32>
    %cst_78 = arith.constant 5.000000e-01 : f32
    %243 = vector.broadcast %cst_78 : f32 to vector<2x128xf32>
    %244 = arith.addf %242, %243 : vector<2x128xf32>
    %245 = arith.select %5, %240, %244 : vector<2x128xi1>, vector<2x128xf32>
    %c64_i32_79 = arith.constant 64 : i32
    %246 = tpu.dynamic_rotate %245 by %c64_i32_79 dim 1 : vector<2x128xf32>, i32 -> vector<2x128xf32>
    %247 = arith.mulf %245, %246 : vector<2x128xf32>
    %248 = arith.select %10, %245, %246 : vector<2x128xi1>, vector<2x128xf32>
    %c32_i32_80 = arith.constant 32 : i32
    %249 = tpu.dynamic_rotate %247 by %c32_i32_80 dim 1 : vector<2x128xf32>, i32 -> vector<2x128xf32>
    %250 = arith.mulf %248, %209 : vector<2x128xf32>
    %251 = arith.addf %249, %250 : vector<2x128xf32>
    %252 = math.tanh %251 : vector<2x128xf32>
    %253 = arith.mulf %245, %252 : vector<2x128xf32>
    %c64_i32_81 = arith.constant 64 : i32
    %254 = tpu.dynamic_rotate %235 by %c64_i32_81 dim 1 : vector<2x128xf32>, i32 -> vector<2x128xf32>
    %cst_82 = arith.constant 1.000000e+00 : f32
    %255 = vector.broadcast %cst_82 : f32 to vector<2x128xf32>
    %256 = arith.select %14, %255, %254 : vector<2x128xi1>, vector<2x128xf32>
    %257 = arith.select %12, %253, %256 : vector<2x128xi1>, vector<2x128xf32>
    %258 = arith.truncf %257 : vector<2x128xf32> to vector<2x128xbf16>
    %c0_83 = arith.constant 0 : index
    %c0_84 = arith.constant 0 : index
    %259 = vector.load %arg3[%c0_83, %c0_84] : memref<128x256xbf16, #tpu.memory_space<vmem>>, vector<128x256xbf16>
    %cst_85 = arith.constant dense<0.000000e+00> : vector<2x256xf32>
    %260 = tpu.matmul %258, %259, %cst_85 {dimension_numbers = #tpu.dot_dimension_numbers<[1], [0], [0], [1], [0, 0, 1, 1], [], []>} : vector<2x128xbf16>, vector<128x256xbf16>, vector<2x256xf32> -> vector<2x256xf32>
    %261 = vector.extract_strided_slice %260 {offsets = [0, 0], sizes = [2, 128], strides = [1, 1]} : vector<2x256xf32> to vector<2x128xf32>
    %262 = vector.extract_strided_slice %260 {offsets = [0, 128], sizes = [2, 128], strides = [1, 1]} : vector<2x256xf32> to vector<2x128xf32>
    %263 = arith.mulf %262, %17 : vector<2x128xf32>
    %264 = math.tanh %263 : vector<2x128xf32>
    %cst_86 = arith.constant 5.000000e-01 : f32
    %265 = vector.broadcast %cst_86 : f32 to vector<2x128xf32>
    %266 = arith.mulf %265, %264 : vector<2x128xf32>
    %cst_87 = arith.constant 5.000000e-01 : f32
    %267 = vector.broadcast %cst_87 : f32 to vector<2x128xf32>
    %268 = arith.addf %266, %267 : vector<2x128xf32>
    %269 = arith.select %5, %264, %268 : vector<2x128xi1>, vector<2x128xf32>
    %c64_i32_88 = arith.constant 64 : i32
    %270 = tpu.dynamic_rotate %269 by %c64_i32_88 dim 1 : vector<2x128xf32>, i32 -> vector<2x128xf32>
    %271 = arith.mulf %269, %270 : vector<2x128xf32>
    %272 = arith.select %10, %269, %270 : vector<2x128xi1>, vector<2x128xf32>
    %c32_i32_89 = arith.constant 32 : i32
    %273 = tpu.dynamic_rotate %271 by %c32_i32_89 dim 1 : vector<2x128xf32>, i32 -> vector<2x128xf32>
    %274 = arith.mulf %272, %233 : vector<2x128xf32>
    %275 = arith.addf %273, %274 : vector<2x128xf32>
    %276 = math.tanh %275 : vector<2x128xf32>
    %277 = arith.mulf %269, %276 : vector<2x128xf32>
    %278 = vector.extract_strided_slice %25 {offsets = [6, 0, 0], sizes = [1, 2, 128], strides = [1, 1, 1]} : vector<8x2x128xf32> to vector<1x2x128xf32>
    %279 = vector.shape_cast %278 : vector<1x2x128xf32> to vector<2x128xf32>
    %280 = arith.addf %279, %261 : vector<2x128xf32>
    %281 = arith.mulf %280, %17 : vector<2x128xf32>
    %282 = math.tanh %281 : vector<2x128xf32>
    %cst_90 = arith.constant 5.000000e-01 : f32
    %283 = vector.broadcast %cst_90 : f32 to vector<2x128xf32>
    %284 = arith.mulf %283, %282 : vector<2x128xf32>
    %cst_91 = arith.constant 5.000000e-01 : f32
    %285 = vector.broadcast %cst_91 : f32 to vector<2x128xf32>
    %286 = arith.addf %284, %285 : vector<2x128xf32>
    %287 = arith.select %5, %282, %286 : vector<2x128xi1>, vector<2x128xf32>
    %c64_i32_92 = arith.constant 64 : i32
    %288 = tpu.dynamic_rotate %287 by %c64_i32_92 dim 1 : vector<2x128xf32>, i32 -> vector<2x128xf32>
    %289 = arith.mulf %287, %288 : vector<2x128xf32>
    %290 = arith.select %10, %287, %288 : vector<2x128xi1>, vector<2x128xf32>
    %c32_i32_93 = arith.constant 32 : i32
    %291 = tpu.dynamic_rotate %289 by %c32_i32_93 dim 1 : vector<2x128xf32>, i32 -> vector<2x128xf32>
    %292 = arith.mulf %290, %251 : vector<2x128xf32>
    %293 = arith.addf %291, %292 : vector<2x128xf32>
    %294 = math.tanh %293 : vector<2x128xf32>
    %295 = arith.mulf %287, %294 : vector<2x128xf32>
    %c64_i32_94 = arith.constant 64 : i32
    %296 = tpu.dynamic_rotate %277 by %c64_i32_94 dim 1 : vector<2x128xf32>, i32 -> vector<2x128xf32>
    %cst_95 = arith.constant 1.000000e+00 : f32
    %297 = vector.broadcast %cst_95 : f32 to vector<2x128xf32>
    %298 = arith.select %14, %297, %296 : vector<2x128xi1>, vector<2x128xf32>
    %299 = arith.select %12, %295, %298 : vector<2x128xi1>, vector<2x128xf32>
    %300 = arith.truncf %299 : vector<2x128xf32> to vector<2x128xbf16>
    %c0_96 = arith.constant 0 : index
    %c0_97 = arith.constant 0 : index
    %301 = vector.load %arg3[%c0_96, %c0_97] : memref<128x256xbf16, #tpu.memory_space<vmem>>, vector<128x256xbf16>
    %cst_98 = arith.constant dense<0.000000e+00> : vector<2x256xf32>
    %302 = tpu.matmul %300, %301, %cst_98 {dimension_numbers = #tpu.dot_dimension_numbers<[1], [0], [0], [1], [0, 0, 1, 1], [], []>} : vector<2x128xbf16>, vector<128x256xbf16>, vector<2x256xf32> -> vector<2x256xf32>
    %303 = vector.extract_strided_slice %302 {offsets = [0, 0], sizes = [2, 128], strides = [1, 1]} : vector<2x256xf32> to vector<2x128xf32>
    %304 = vector.extract_strided_slice %302 {offsets = [0, 128], sizes = [2, 128], strides = [1, 1]} : vector<2x256xf32> to vector<2x128xf32>
    %305 = arith.mulf %304, %17 : vector<2x128xf32>
    %306 = math.tanh %305 : vector<2x128xf32>
    %cst_99 = arith.constant 5.000000e-01 : f32
    %307 = vector.broadcast %cst_99 : f32 to vector<2x128xf32>
    %308 = arith.mulf %307, %306 : vector<2x128xf32>
    %cst_100 = arith.constant 5.000000e-01 : f32
    %309 = vector.broadcast %cst_100 : f32 to vector<2x128xf32>
    %310 = arith.addf %308, %309 : vector<2x128xf32>
    %311 = arith.select %5, %306, %310 : vector<2x128xi1>, vector<2x128xf32>
    %c64_i32_101 = arith.constant 64 : i32
    %312 = tpu.dynamic_rotate %311 by %c64_i32_101 dim 1 : vector<2x128xf32>, i32 -> vector<2x128xf32>
    %313 = arith.mulf %311, %312 : vector<2x128xf32>
    %314 = arith.select %10, %311, %312 : vector<2x128xi1>, vector<2x128xf32>
    %c32_i32_102 = arith.constant 32 : i32
    %315 = tpu.dynamic_rotate %313 by %c32_i32_102 dim 1 : vector<2x128xf32>, i32 -> vector<2x128xf32>
    %316 = arith.mulf %314, %275 : vector<2x128xf32>
    %317 = arith.addf %315, %316 : vector<2x128xf32>
    %318 = math.tanh %317 : vector<2x128xf32>
    %319 = arith.mulf %311, %318 : vector<2x128xf32>
    %320 = vector.extract_strided_slice %25 {offsets = [7, 0, 0], sizes = [1, 2, 128], strides = [1, 1, 1]} : vector<8x2x128xf32> to vector<1x2x128xf32>
    %321 = vector.shape_cast %320 : vector<1x2x128xf32> to vector<2x128xf32>
    %322 = arith.addf %321, %303 : vector<2x128xf32>
    %323 = arith.mulf %322, %17 : vector<2x128xf32>
    %324 = math.tanh %323 : vector<2x128xf32>
    %cst_103 = arith.constant 5.000000e-01 : f32
    %325 = vector.broadcast %cst_103 : f32 to vector<2x128xf32>
    %326 = arith.mulf %325, %324 : vector<2x128xf32>
    %cst_104 = arith.constant 5.000000e-01 : f32
    %327 = vector.broadcast %cst_104 : f32 to vector<2x128xf32>
    %328 = arith.addf %326, %327 : vector<2x128xf32>
    %329 = arith.select %5, %324, %328 : vector<2x128xi1>, vector<2x128xf32>
    %c64_i32_105 = arith.constant 64 : i32
    %330 = tpu.dynamic_rotate %329 by %c64_i32_105 dim 1 : vector<2x128xf32>, i32 -> vector<2x128xf32>
    %331 = arith.mulf %329, %330 : vector<2x128xf32>
    %332 = arith.select %10, %329, %330 : vector<2x128xi1>, vector<2x128xf32>
    %c32_i32_106 = arith.constant 32 : i32
    %333 = tpu.dynamic_rotate %331 by %c32_i32_106 dim 1 : vector<2x128xf32>, i32 -> vector<2x128xf32>
    %334 = arith.mulf %332, %293 : vector<2x128xf32>
    %335 = arith.addf %333, %334 : vector<2x128xf32>
    %336 = math.tanh %335 : vector<2x128xf32>
    %337 = arith.mulf %329, %336 : vector<2x128xf32>
    %c64_i32_107 = arith.constant 64 : i32
    %338 = tpu.dynamic_rotate %319 by %c64_i32_107 dim 1 : vector<2x128xf32>, i32 -> vector<2x128xf32>
    %cst_108 = arith.constant 1.000000e+00 : f32
    %339 = vector.broadcast %cst_108 : f32 to vector<2x128xf32>
    %340 = arith.select %14, %339, %338 : vector<2x128xi1>, vector<2x128xf32>
    %341 = arith.select %12, %337, %340 : vector<2x128xi1>, vector<2x128xf32>
    %342 = arith.truncf %341 : vector<2x128xf32> to vector<2x128xbf16>
    %c0_109 = arith.constant 0 : index
    %c0_110 = arith.constant 0 : index
    %343 = vector.load %arg3[%c0_109, %c0_110] : memref<128x256xbf16, #tpu.memory_space<vmem>>, vector<128x256xbf16>
    %cst_111 = arith.constant dense<0.000000e+00> : vector<2x256xf32>
    %344 = tpu.matmul %342, %343, %cst_111 {dimension_numbers = #tpu.dot_dimension_numbers<[1], [0], [0], [1], [0, 0, 1, 1], [], []>} : vector<2x128xbf16>, vector<128x256xbf16>, vector<2x256xf32> -> vector<2x256xf32>
    %345 = vector.extract_strided_slice %344 {offsets = [0, 128], sizes = [2, 128], strides = [1, 1]} : vector<2x256xf32> to vector<2x128xf32>
    %346 = arith.mulf %345, %17 : vector<2x128xf32>
    %347 = math.tanh %346 : vector<2x128xf32>
    %cst_112 = arith.constant 5.000000e-01 : f32
    %348 = vector.broadcast %cst_112 : f32 to vector<2x128xf32>
    %349 = arith.mulf %348, %347 : vector<2x128xf32>
    %cst_113 = arith.constant 5.000000e-01 : f32
    %350 = vector.broadcast %cst_113 : f32 to vector<2x128xf32>
    %351 = arith.addf %349, %350 : vector<2x128xf32>
    %352 = arith.select %5, %347, %351 : vector<2x128xi1>, vector<2x128xf32>
    %c64_i32_114 = arith.constant 64 : i32
    %353 = tpu.dynamic_rotate %352 by %c64_i32_114 dim 1 : vector<2x128xf32>, i32 -> vector<2x128xf32>
    %354 = arith.mulf %352, %353 : vector<2x128xf32>
    %355 = arith.select %10, %352, %353 : vector<2x128xi1>, vector<2x128xf32>
    %c32_i32_115 = arith.constant 32 : i32
    %356 = tpu.dynamic_rotate %354 by %c32_i32_115 dim 1 : vector<2x128xf32>, i32 -> vector<2x128xf32>
    %357 = arith.mulf %355, %317 : vector<2x128xf32>
    %358 = arith.addf %356, %357 : vector<2x128xf32>
    %359 = math.tanh %358 : vector<2x128xf32>
    %360 = arith.mulf %352, %359 : vector<2x128xf32>
    %361 = arith.truncf %360 : vector<2x128xf32> to vector<2x128xbf16>
    %c0_116 = arith.constant 0 : index
    %c0_117 = arith.constant 0 : index
    %362 = vector.load %arg4[%c0_116, %c0_117] : memref<128x1xbf16, #tpu.memory_space<vmem>>, vector<128x1xbf16>
    %cst_118 = arith.constant dense<0.000000e+00> : vector<2x1xf32>
    %363 = tpu.matmul %361, %362, %cst_118 {dimension_numbers = #tpu.dot_dimension_numbers<[1], [0], [0], [1], [0, 0, 1, 1], [], []>} : vector<2x128xbf16>, vector<128x1xbf16>, vector<2x1xf32> -> vector<2x1xf32>
    %c0_119 = arith.constant 0 : index
    %c0_120 = arith.constant 0 : index
    %364 = vector.load %arg5[%c0_119, %c0_120] : memref<1x1xf32, #tpu.memory_space<vmem>>, vector<1x1xf32>
    %365 = vector.broadcast %364 : vector<1x1xf32> to vector<2x1xf32>
    %366 = arith.addf %363, %365 : vector<2x1xf32>
    %c0_121 = arith.constant 0 : index
    %c0_122 = arith.constant 0 : index
    %367 = vector.load %arg6[%c0_121, %c0_122] : memref<2x1xf32, #tpu.memory_space<vmem>>, vector<2x1xf32>
    tpu.vector_store %arg6[%c0_121, %c0_122], %366 {strides = array<i32>} : memref<2x1xf32, #tpu.memory_space<vmem>>, vector<2x1xf32>,
    return
  }
}

</mosaic_0001>

<bundles_post_ra>
// kernel: lstm_model_forward.1
= control target key start
LH: loop header
LB: loop body
LE: loop exit
PB: predicated region body
PF: predicated region fallthrough
CT: control target
= control target key end

     0   :  { %v1102_v0 = vmov 0   ;;  %v26_v2 = vlaneseq  ;;  %v1103_v9 = vmov 0.5   ;;  %s1105_s7 = smov 32   ;;  %v1106_v36 = vmov 0.0   ;;  %s1672_s0 = inlined_call_operand.vmem [shape: f32[8,2,1], index: 0, kind: input, shape index: {}]   ;;  %s1673_s1 = inlined_call_operand.vmem [shape: f32[1,1,128], index: 1, kind: input, shape index: {}]   ;;  %s1674_s2 = inlined_call_operand.vmem [shape: f32[1,1,128], index: 2, kind: input, shape index: {}]   ;;  %s1675_s3 = inlined_call_operand.vmem [shape: bf16[128,256], index: 3, kind: input, shape index: {}]   ;;  %s1676_s4 = inlined_call_operand.vmem [shape: bf16[128,1], index: 4, kind: input, shape index: {}]   ;;  %s1677_s5 = inlined_call_operand.<no memory space> [shape: f32[1,1], index: 5, kind: input, shape index: {}]   ;;  %s1678_s6 = inlined_call_operand.vmem [shape: f32[2,1], index: 6, kind: output, shape index: {}]  }
   0x1   :  { %1005 = vset.pattern.permute.xlu0 %v1102_v0  ;;  %v37_v1 = vld [vmem:[%s1672_s0] sm:$0x3]  ;;  %263 = vmatprep.mubr.bf16.mxu0 %v1102_v0  ;;  %v38_v17 = vld [vmem:[%s1672_s0 + $0x2] sm:$0x3]  ;;  %v1186_v18 = vld [vmem:[%s1675_s3 + $0x74] ss:$8 sps:$4 sm:$0xff]  }
   0x2   :  { %48 = vperm.xlu0 %1005, %v37_v1   ;;  %340 = vmatprep.mubr.bf16.mxu1 %v1102_v0  ;;  %v1149_v3 = vand.u32 127, %v26_v2  ;;  %v1156_v4 = vld [vmem:[%s1673_s1] ss:$0 sm:$0xff]  ;;  %s1104_s1 = smov 64   ;;  %v1191_v19 = vld [vmem:[%s1675_s3 + $0x70] ss:$8 sps:$4 sm:$0xff]  }
   0x3   :  { %v1165_v6 = vld [vmem:[%s1674_s2] ss:$0 sm:$0xff]  ;;  %231 = vmatprep.subr.bf16.mxu0 %v1186_v18  ;;  %v1197_v20 = vld [vmem:[%s1675_s3 + $0x64] ss:$8 sps:$4 sm:$0xff]   ;;  %308 = vmatprep.subr.bf16.mxu1 %v1186_v18  ;;  %v1209_v22 = vld [vmem:[%s1675_s3 + $0x54] ss:$8 sps:$4 sm:$0xff]  }
   0x4   :  { %vm28_vm0 = vcmp.ge.s32.totalorder %v1149_v3, 64  ;;  %vm29_vm1 = vcmp.lt.s32.totalorder %v1149_v3, 96  ;;  %232 = vmatpush1.bf16.msra.mxu0 %v1191_v19  ;;  %v1204_v21 = vld [vmem:[%s1675_s3 + $0x60] ss:$8 sps:$4 sm:$0xff]   ;;  %309 = vmatpush1.bf16.msra.mxu1 %v1191_v19  ;;  %v1218_v23 = vld [vmem:[%s1675_s3 + $0x50] ss:$8 sps:$4 sm:$0xff]  }
   0x5   :  { %vm1158_vm2 = vmand %vm28_vm0, %vm29_vm1  ;;  %233 = vmatprep.subr.bf16.mxu0 %v1197_v20  ;;  %310 = vmatprep.subr.bf16.mxu1 %v1197_v20  ;;  %v1228_v24 = vld [vmem:[%s1675_s3 + $0x44] ss:$8 sps:$4 sm:$0xff]   ;;  %v1233_v25 = vld [vmem:[%s1675_s3 + $0x40] ss:$8 sps:$4 sm:$0xff]   ;;  %vm31_vm3 = vcmp.ge.s32.totalorder %v1149_v3, 32  ;;  %vm32_vm4 = vcmp.lt.s32.totalorder %v1149_v3, 64 }
   0x6   :  { %v1170_v10 = vsel %vm1158_vm2, 1.0, %v1103_v9  ;;  %v1241_v26 = vld [vmem:[%s1675_s3 + $0x34] ss:$8 sps:$4 sm:$0xff]   ;;  %v1246_v27 = vld [vmem:[%s1675_s3 + $0x30] ss:$8 sps:$4 sm:$0xff]   ;;  %vm1303_vm5 = vmand %vm31_vm3, %vm32_vm4  ;;  %vm35_vm6 = vcmp.eq.s32.totalorder %v1149_v3, 0 }
   0x7   :  { %v1252_v28 = vld [vmem:[%s1675_s3 + $0x24] ss:$8 sps:$4 sm:$0xff]   ;;  %v1260_v29 = vld [vmem:[%s1675_s3 + $0x20] ss:$8 sps:$4 sm:$0xff]   ;;  %v1267_v30 = vld [vmem:[%s1675_s3 + $0x14] ss:$8 sps:$4 sm:$0xff]  }
   0x8   :  { %234 = vmatpush1.bf16.msra.mxu0 %v1204_v21  ;;  %311 = vmatpush1.bf16.msra.mxu1 %v1204_v21  ;;  %v1274_v32 = vld [vmem:[%s1675_s3 + $0x10] ss:$8 sps:$4 sm:$0xff]   ;;  %v1286_v34 = vld [vmem:[%s1675_s3 + $0x4] ss:$8 sps:$4 sm:$0xff]   ;;  %v1291_v35 = vld [vmem:[%s1675_s3] ss:$8 sps:$4 sm:$0xff]  }
   0x9   :  { %235 = vmatprep.subr.bf16.mxu0 %v1209_v22  ;;  %312 = vmatprep.subr.bf16.mxu1 %v1209_v22  ;;  %vm34_vm7 = vcmp.ge.s32.totalorder %v1149_v3, 96  ;;  %vm1107_vm8 = vmmov 0   ;;  %v1035_v5 = vld [vmem:[%s1676_s4 + $0x10] sm:$0xff]   ;;  %vm937_vm9 = vcmask 1024  }
   0xc   :  { %236 = vmatpush1.bf16.msra.mxu0 %v1218_v23  ;;  %313 = vmatpush1.bf16.msra.mxu1 %v1218_v23 }
   0xd   :  { %237 = vmatprep.subr.bf16.mxu0 %v1228_v24  ;;  %314 = vmatprep.subr.bf16.mxu1 %v1228_v24 }
  0x10   :  { %238 = vmatpush1.bf16.msra.mxu0 %v1233_v25  ;;  %315 = vmatpush1.bf16.msra.mxu1 %v1233_v25 }
  0x11   :  { %239 = vmatprep.subr.bf16.mxu0 %v1241_v26  ;;  %316 = vmatprep.subr.bf16.mxu1 %v1241_v26 }
  0x14   :  { %240 = vmatpush1.bf16.msra.mxu0 %v1246_v27  ;;  %317 = vmatpush1.bf16.msra.mxu1 %v1246_v27 }
  0x15   :  { %241 = vmatprep.subr.bf16.mxu0 %v1252_v28  ;;  %318 = vmatprep.subr.bf16.mxu1 %v1252_v28 }
  0x18   :  { %242 = vmatpush1.bf16.msra.mxu0 %v1260_v29  ;;  %319 = vmatpush1.bf16.msra.mxu1 %v1260_v29 }
  0x19   :  { %243 = vmatprep.subr.bf16.mxu0 %v1267_v30  ;;  %320 = vmatprep.subr.bf16.mxu1 %v1267_v30 }
  0x1c   :  { %244 = vmatpush1.bf16.msra.mxu0 %v1274_v32  ;;  %321 = vmatpush1.bf16.msra.mxu1 %v1274_v32 }
  0x1d   :  { %245 = vmatprep.subr.bf16.mxu0 %v1286_v34  ;;  %322 = vmatprep.subr.bf16.mxu1 %v1286_v34 }
  0x20   :  { %246 = vmatpush1.bf16.msra.mxu0 %v1291_v35  ;;  %323 = vmatpush1.bf16.msra.mxu1 %v1291_v35 }
  0x21   :  { %385 = vmatprep.subr.bf16.mxu0 %v1186_v18  ;;  %462 = vmatprep.subr.bf16.mxu1 %v1186_v18 }
  0x7d   :  { %v49_v7 = vpop.permute.xlu0 %48 }
  0x7e   :  { %v92_v8 = vmul.f32 %v1156_v4, %v49_v7 }
  0x80   :  { %v107_v11 = vadd.f32 %v1165_v6, %v92_v8 }
  0x82   :  { %v115_v12 = vmul.f32 %v107_v11, %v1170_v10 }
  0x84   :  { %1038 = vtanh.f32 %v115_v12  ;;  %v39_v12 = vld [vmem:[%s1672_s0 + $0x4] sm:$0x3] }
  0x91   :  { %v1039_v13 = vpop.eup %1038 }
  0x92   :  { %v117_v14 = vmul.f32 0.5, %v1039_v13 }
  0x94   :  { %v118_v15 = vadd.f32 0.5, %v117_v14 }
  0x96   :  { %v1176_v16 = vsel %vm1158_vm2, %v1039_v13, %v118_v15 }
  0x97   :  { %120 = vrot.lane.b32.xlu0 %v1176_v16, %s1104_s1 }
  0x9b   :  { %53 = vperm.xlu0 %1005, %v38_v17  }
 0x109   :  { %v121_v31 = vpop.permute.xlu0 %120 }
 0x10a   :  { %v122_v33 = vmul.f32 %v121_v31, %v1176_v16  ;;  %v123_v38 = vsel %vm1303_vm5, %v1176_v16, %v121_v31 }
 0x10b   :  { %v126_v39 = vmul.f32 0.0, %v123_v38 }
 0x10c   :  { %124 = vrot.lane.b32.xlu1 %v122_v33, %s1105_s7 }
 0x110   :  { %130 = vrot.lane.b32.xlu1 %v1106_v36, %s1104_s1 }
 0x116   :  { %v54_v48 = vpop.permute.xlu0 %53 }
 0x117   :  { %v93_v49 = vmul.f32 %v1156_v4, %v54_v48 }
 0x119   :  { %v108_v50 = vadd.f32 %v1165_v6, %v93_v49 }
 0x17e   :  { %v125_v40 = vpop.permute.xlu1 %124 }
 0x17f   :  { %v1310_v41 = vadd.f32 %v126_v39, %v125_v40 }
 0x181   :  { %1040 = vtanh.f32 %v1310_v41 }
 0x182   :  { %v131_v42 = vpop.permute.xlu1 %130 }
 0x183   :  { %v132_v44 = vsel %vm35_vm6, 1.0, %v131_v42 }
 0x18e   :  { %v1041_v43 = vpop.eup %1040 }
 0x18f   :  { %v129_v45 = vmul.f32 %v1041_v43, %v1176_v16 }
 0x191   :  { %v133_v46 = vsel %vm34_vm7, %v129_v45, %v132_v44 }
 0x192   :  { %v134_v47 = vpack.c.bf16 %v133_v46, %v133_v46 }
 0x194   :  { %264 = vmatmul.mubr.bf16.vlgmr.msra.gmra.mxu0 %v134_v47 }
 0x195   :  { %386 = vmatpush1.bf16.msra.mxu0 %v1191_v19  ;;  %417 = vmatprep.mubr.bf16.mxu0 %v1102_v0 }
 0x196   :  { %387 = vmatprep.subr.bf16.mxu0 %v1197_v20 }
 0x199   :  { %388 = vmatpush1.bf16.msra.mxu0 %v1204_v21 }
 0x19a   :  { %389 = vmatprep.subr.bf16.mxu0 %v1209_v22 }
 0x19d   :  { %390 = vmatpush1.bf16.msra.mxu0 %v1218_v23 }
 0x19e   :  { %391 = vmatprep.subr.bf16.mxu0 %v1228_v24 }
 0x1a1   :  { %392 = vmatpush1.bf16.msra.mxu0 %v1233_v25 }
 0x1a2   :  { %393 = vmatprep.subr.bf16.mxu0 %v1241_v26 }
 0x1a5   :  { %394 = vmatpush1.bf16.msra.mxu0 %v1246_v27 }
 0x1a6   :  { %395 = vmatprep.subr.bf16.mxu0 %v1252_v28 }
 0x1a9   :  { %396 = vmatpush1.bf16.msra.mxu0 %v1260_v29 }
 0x1aa   :  { %397 = vmatprep.subr.bf16.mxu0 %v1267_v30 }
 0x1ad   :  { %398 = vmatpush1.bf16.msra.mxu0 %v1274_v32 }
 0x1ae   :  { %399 = vmatprep.subr.bf16.mxu0 %v1286_v34 }
 0x1b1   :  { %400 = vmatpush1.bf16.msra.mxu0 %v1291_v35 }
 0x1b2   :  { %539 = vmatprep.subr.bf16.mxu0 %v1186_v18 }
 0x254   :  { %v265_v51 = vpop.f32.mrf.mxu0 }
 0x255   :  { %v287_v52 = vadd.f32 %v265_v51, %v108_v50 }
 0x256   :  { %v267_v53 = vpop.f32.mrf.mxu0 }
 0x257   :  { %v288_v54 = vmul.f32 %v287_v52, %v1170_v10  ;;  %v272_v55 = vmul.f32 %v267_v53, %v1170_v10 }
 0x258   :  { %v269_v56 = vpop.f32.mrf.mxu0 }
 0x259   :  { %1042 = vtanh.f32 %v288_v54 }
 0x25a   :  { %1044 = vtanh.f32 %v272_v55  ;;  %v270_v57 = vpop.f32.mrf.mxu0 }
 0x266   :  { %v1043_v58 = vpop.eup %1042 }
 0x267   :  { %v1045_v59 = vpop.eup %1044  ;;  %v290_v60 = vmul.f32 0.5, %v1043_v58 }
 0x268   :  { %v274_v61 = vmul.f32 0.5, %v1045_v59 }
 0x269   :  { %v291_v62 = vadd.f32 0.5, %v290_v60 }
 0x26a   :  { %v275_v63 = vadd.f32 0.5, %v274_v61 }
 0x26b   :  { %v292_v1 = vsel %vm1158_vm2, %v1043_v58, %v291_v62 }
 0x26c   :  { %v276_v2 = vsel %vm1158_vm2, %v1045_v59, %v275_v63  ;;  %293 = vrot.lane.b32.xlu0 %v292_v1, %s1104_s1 }
 0x26d   :  { %277 = vrot.lane.b32.xlu1 %v276_v2, %s1104_s1 }
 0x2de   :  { %v294_v7 = vpop.permute.xlu0 %293 }
 0x2df   :  { %v278_v8 = vpop.permute.xlu1 %277  ;;  %v295_v9 = vmul.f32 %v294_v7, %v292_v1  ;;  %v296_v33 = vsel %vm1303_vm5, %v292_v1, %v294_v7 }
 0x2e0   :  { %v279_v11 = vmul.f32 %v278_v8, %v276_v2  ;;  %v280_v13 = vsel %vm1303_vm5, %v276_v2, %v278_v8  ;;  %v299_v39 = vmul.f32 %v296_v33, %v1310_v41 }
 0x2e1   :  { %297 = vrot.lane.b32.xlu0 %v295_v9, %s1105_s7  ;;  %v283_v14 = vmul.f32 0.0, %v280_v13 }
 0x2e2   :  { %281 = vrot.lane.b32.xlu1 %v279_v11, %s1105_s7  ;;  %v40_v11 = vld [vmem:[%s1672_s0 + $0x6] sm:$0x3] }
 0x2e5   :  { %58 = vperm.xlu0 %1005, %v39_v12  }
 0x353   :  { %v298_v38 = vpop.permute.xlu0 %297 }
 0x354   :  { %v282_v15 = vpop.permute.xlu1 %281  ;;  %v1361_v40 = vadd.f32 %v299_v39, %v298_v38 }
 0x355   :  { %v1354_v16 = vadd.f32 %v283_v14, %v282_v15 }
 0x357   :  { %1046 = vtanh.f32 %v1354_v16 }
 0x358   :  { %1048 = vtanh.f32 %v1361_v40 }
 0x360   :  { %v59_v41 = vpop.permute.xlu0 %58 }
 0x361   :  { %v94_v48 = vmul.f32 %v1156_v4, %v59_v41 }
 0x363   :  { %v109_v49 = vadd.f32 %v1165_v6, %v94_v48 }
 0x364   :  { %v1047_v17 = vpop.eup %1046 }
 0x365   :  { %v286_v31 = vmul.f32 %v1047_v17, %v276_v2  ;;  %v1049_v42 = vpop.eup %1048 }
 0x366   :  { %v302_v44 = vmul.f32 %v1049_v42, %v292_v1 }
 0x367   :  { %303 = vrot.lane.b32.xlu1 %v286_v31, %s1104_s1 }
 0x3d9   :  { %v304_v43 = vpop.permute.xlu1 %303 }
 0x3da   :  { %v305_v45 = vsel %vm35_vm6, 1.0, %v304_v43 }
 0x3db   :  { %v306_v46 = vsel %vm34_vm7, %v302_v44, %v305_v45 }
 0x3dc   :  { %v307_v47 = vpack.c.bf16 %v306_v46, %v306_v46 }
 0x3de   :  { %341 = vmatmul.mubr.bf16.vlgmr.msra.gmra.mxu1 %v307_v47 }
 0x3df   :  { %463 = vmatpush1.bf16.msra.mxu1 %v1191_v19  ;;  %494 = vmatprep.mubr.bf16.mxu1 %v1102_v0 }
 0x3e0   :  { %464 = vmatprep.subr.bf16.mxu1 %v1197_v20 }
 0x3e3   :  { %465 = vmatpush1.bf16.msra.mxu1 %v1204_v21 }
 0x3e4   :  { %466 = vmatprep.subr.bf16.mxu1 %v1209_v22 }
 0x3e7   :  { %467 = vmatpush1.bf16.msra.mxu1 %v1218_v23 }
 0x3e8   :  { %468 = vmatprep.subr.bf16.mxu1 %v1228_v24 }
 0x3eb   :  { %469 = vmatpush1.bf16.msra.mxu1 %v1233_v25 }
 0x3ec   :  { %470 = vmatprep.subr.bf16.mxu1 %v1241_v26 }
 0x3ef   :  { %471 = vmatpush1.bf16.msra.mxu1 %v1246_v27 }
 0x3f0   :  { %472 = vmatprep.subr.bf16.mxu1 %v1252_v28 }
 0x3f3   :  { %473 = vmatpush1.bf16.msra.mxu1 %v1260_v29 }
 0x3f4   :  { %474 = vmatprep.subr.bf16.mxu1 %v1267_v30 }
 0x3f7   :  { %475 = vmatpush1.bf16.msra.mxu1 %v1274_v32 }
 0x3f8   :  { %476 = vmatprep.subr.bf16.mxu1 %v1286_v34 }
 0x3fb   :  { %477 = vmatpush1.bf16.msra.mxu1 %v1291_v35 }
 0x3fc   :  { %616 = vmatprep.subr.bf16.mxu1 %v1186_v18 }
 0x49e   :  { %v342_v50 = vpop.f32.mrf.mxu1 }
 0x49f   :  { %v364_v51 = vadd.f32 %v342_v50, %v109_v49 }
 0x4a0   :  { %v344_v52 = vpop.f32.mrf.mxu1 }
 0x4a1   :  { %v365_v53 = vmul.f32 %v364_v51, %v1170_v10  ;;  %v349_v54 = vmul.f32 %v344_v52, %v1170_v10 }
 0x4a2   :  { %v346_v55 = vpop.f32.mrf.mxu1 }
 0x4a3   :  { %1050 = vtanh.f32 %v365_v53 }
 0x4a4   :  { %1052 = vtanh.f32 %v349_v54  ;;  %v347_v56 = vpop.f32.mrf.mxu1 }
 0x4b0   :  { %v1051_v57 = vpop.eup %1050 }
 0x4b1   :  { %v1053_v58 = vpop.eup %1052  ;;  %v367_v59 = vmul.f32 0.5, %v1051_v57 }
 0x4b2   :  { %v351_v60 = vmul.f32 0.5, %v1053_v58 }
 0x4b3   :  { %v368_v61 = vadd.f32 0.5, %v367_v59 }
 0x4b4   :  { %v352_v62 = vadd.f32 0.5, %v351_v60 }
 0x4b5   :  { %v369_v63 = vsel %vm1158_vm2, %v1051_v57, %v368_v61 }
 0x4b6   :  { %370 = vrot.lane.b32.xlu0 %v369_v63, %s1104_s1  ;;  %v353_v1 = vsel %vm1158_vm2, %v1053_v58, %v352_v62 }
 0x4b7   :  { %354 = vrot.lane.b32.xlu1 %v353_v1, %s1104_s1 }
 0x528   :  { %v371_v2 = vpop.permute.xlu0 %370 }
 0x529   :  { %v372_v7 = vmul.f32 %v371_v2, %v369_v63  ;;  %v355_v8 = vpop.permute.xlu1 %354  ;;  %v373_v33 = vsel %vm1303_vm5, %v369_v63, %v371_v2 }
 0x52a   :  { %v356_v9 = vmul.f32 %v355_v8, %v353_v1  ;;  %v357_v12 = vsel %vm1303_vm5, %v353_v1, %v355_v8  ;;  %v376_v39 = vmul.f32 %v373_v33, %v1361_v40 }
 0x52b   :  { %374 = vrot.lane.b32.xlu0 %v372_v7, %s1105_s7  ;;  %v360_v13 = vmul.f32 %v357_v12, %v1354_v16 }
 0x52c   :  { %358 = vrot.lane.b32.xlu1 %v356_v9, %s1105_s7  ;;  %v41_v9 = vld [vmem:[%s1672_s0 + $0x8] sm:$0x3] }
 0x52f   :  { %63 = vperm.xlu0 %1005, %v40_v11  }
 0x59d   :  { %v375_v38 = vpop.permute.xlu0 %374 }
 0x59e   :  { %v359_v14 = vpop.permute.xlu1 %358  ;;  %v1410_v42 = vadd.f32 %v376_v39, %v375_v38 }
 0x59f   :  { %v1403_v15 = vadd.f32 %v360_v13, %v359_v14 }
 0x5a1   :  { %1054 = vtanh.f32 %v1403_v15 }
 0x5a2   :  { %1056 = vtanh.f32 %v1410_v42 }
 0x5aa   :  { %v64_v40 = vpop.permute.xlu0 %63 }
 0x5ab   :  { %v95_v41 = vmul.f32 %v1156_v4, %v64_v40 }
 0x5ad   :  { %v110_v48 = vadd.f32 %v1165_v6, %v95_v41 }
 0x5ae   :  { %v1055_v17 = vpop.eup %1054 }
 0x5af   :  { %v363_v31 = vmul.f32 %v1055_v17, %v353_v1  ;;  %v1057_v16 = vpop.eup %1056 }
 0x5b0   :  { %v379_v43 = vmul.f32 %v1057_v16, %v369_v63 }
 0x5b1   :  { %380 = vrot.lane.b32.xlu1 %v363_v31, %s1104_s1 }
 0x623   :  { %v381_v44 = vpop.permute.xlu1 %380 }
 0x624   :  { %v382_v45 = vsel %vm35_vm6, 1.0, %v381_v44 }
 0x625   :  { %v383_v46 = vsel %vm34_vm7, %v379_v43, %v382_v45 }
 0x626   :  { %v384_v47 = vpack.c.bf16 %v383_v46, %v383_v46 }
 0x628   :  { %418 = vmatmul.mubr.bf16.vlgmr.msra.gmra.mxu0 %v384_v47 }
 0x629   :  { %540 = vmatpush1.bf16.msra.mxu0 %v1191_v19  ;;  %571 = vmatprep.mubr.bf16.mxu0 %v1102_v0 }
 0x62a   :  { %541 = vmatprep.subr.bf16.mxu0 %v1197_v20 }
 0x62d   :  { %542 = vmatpush1.bf16.msra.mxu0 %v1204_v21 }
 0x62e   :  { %543 = vmatprep.subr.bf16.mxu0 %v1209_v22 }
 0x631   :  { %544 = vmatpush1.bf16.msra.mxu0 %v1218_v23 }
 0x632   :  { %545 = vmatprep.subr.bf16.mxu0 %v1228_v24 }
 0x635   :  { %546 = vmatpush1.bf16.msra.mxu0 %v1233_v25 }
 0x636   :  { %547 = vmatprep.subr.bf16.mxu0 %v1241_v26 }
 0x639   :  { %548 = vmatpush1.bf16.msra.mxu0 %v1246_v27 }
 0x63a   :  { %549 = vmatprep.subr.bf16.mxu0 %v1252_v28 }
 0x63d   :  { %550 = vmatpush1.bf16.msra.mxu0 %v1260_v29 }
 0x63e   :  { %551 = vmatprep.subr.bf16.mxu0 %v1267_v30 }
 0x641   :  { %552 = vmatpush1.bf16.msra.mxu0 %v1274_v32 }
 0x642   :  { %553 = vmatprep.subr.bf16.mxu0 %v1286_v34 }
 0x645   :  { %554 = vmatpush1.bf16.msra.mxu0 %v1291_v35 }
 0x646   :  { %693 = vmatprep.subr.bf16.mxu0 %v1186_v18 }
 0x6e8   :  { %v419_v49 = vpop.f32.mrf.mxu0 }
 0x6e9   :  { %v441_v50 = vadd.f32 %v419_v49, %v110_v48 }
 0x6ea   :  { %v421_v51 = vpop.f32.mrf.mxu0 }
 0x6eb   :  { %v442_v52 = vmul.f32 %v441_v50, %v1170_v10  ;;  %v426_v53 = vmul.f32 %v421_v51, %v1170_v10 }
 0x6ec   :  { %v423_v54 = vpop.f32.mrf.mxu0 }
 0x6ed   :  { %1058 = vtanh.f32 %v442_v52 }
 0x6ee   :  { %1060 = vtanh.f32 %v426_v53  ;;  %v424_v55 = vpop.f32.mrf.mxu0 }
 0x6fa   :  { %v1059_v56 = vpop.eup %1058 }
 0x6fb   :  { %v1061_v57 = vpop.eup %1060  ;;  %v444_v58 = vmul.f32 0.5, %v1059_v56 }
 0x6fc   :  { %v428_v59 = vmul.f32 0.5, %v1061_v57 }
 0x6fd   :  { %v445_v60 = vadd.f32 0.5, %v444_v58 }
 0x6fe   :  { %v429_v61 = vadd.f32 0.5, %v428_v59 }
 0x6ff   :  { %v446_v62 = vsel %vm1158_vm2, %v1059_v56, %v445_v60 }
 0x700   :  { %447 = vrot.lane.b32.xlu0 %v446_v62, %s1104_s1  ;;  %v430_v63 = vsel %vm1158_vm2, %v1061_v57, %v429_v61 }
 0x701   :  { %431 = vrot.lane.b32.xlu1 %v430_v63, %s1104_s1 }
 0x772   :  { %v448_v1 = vpop.permute.xlu0 %447 }
 0x773   :  { %v449_v2 = vmul.f32 %v448_v1, %v446_v62  ;;  %v432_v7 = vpop.permute.xlu1 %431  ;;  %v450_v33 = vsel %vm1303_vm5, %v446_v62, %v448_v1 }
 0x774   :  { %v433_v8 = vmul.f32 %v432_v7, %v430_v63  ;;  %v434_v11 = vsel %vm1303_vm5, %v430_v63, %v432_v7  ;;  %v453_v39 = vmul.f32 %v450_v33, %v1410_v42  ;;  %v42_v7 = vld [vmem:[%s1672_s0 + $0xa] sm:$0x3] }
 0x775   :  { %451 = vrot.lane.b32.xlu0 %v449_v2, %s1105_s7  ;;  %v437_v12 = vmul.f32 %v434_v11, %v1403_v15 }
 0x776   :  { %435 = vrot.lane.b32.xlu1 %v433_v8, %s1105_s7 }
 0x779   :  { %68 = vperm.xlu0 %1005, %v41_v9  }
 0x7e7   :  { %v452_v38 = vpop.permute.xlu0 %451 }
 0x7e8   :  { %v436_v13 = vpop.permute.xlu1 %435  ;;  %v1459_v16 = vadd.f32 %v453_v39, %v452_v38 }
 0x7e9   :  { %v1452_v14 = vadd.f32 %v437_v12, %v436_v13 }
 0x7eb   :  { %1062 = vtanh.f32 %v1452_v14 }
 0x7ec   :  { %1064 = vtanh.f32 %v1459_v16 }
 0x7f4   :  { %v69_v42 = vpop.permute.xlu0 %68 }
 0x7f5   :  { %v96_v40 = vmul.f32 %v1156_v4, %v69_v42 }
 0x7f7   :  { %v111_v41 = vadd.f32 %v1165_v6, %v96_v40 }
 0x7f8   :  { %v1063_v17 = vpop.eup %1062 }
 0x7f9   :  { %v440_v31 = vmul.f32 %v1063_v17, %v430_v63  ;;  %v1065_v15 = vpop.eup %1064 }
 0x7fa   :  { %v456_v43 = vmul.f32 %v1065_v15, %v446_v62 }
 0x7fb   :  { %457 = vrot.lane.b32.xlu1 %v440_v31, %s1104_s1 }
 0x86d   :  { %v458_v44 = vpop.permute.xlu1 %457 }
 0x86e   :  { %v459_v45 = vsel %vm35_vm6, 1.0, %v458_v44 }
 0x86f   :  { %v460_v46 = vsel %vm34_vm7, %v456_v43, %v459_v45 }
 0x870   :  { %v461_v47 = vpack.c.bf16 %v460_v46, %v460_v46 }
 0x872   :  { %495 = vmatmul.mubr.bf16.vlgmr.msra.gmra.mxu1 %v461_v47 }
 0x873   :  { %617 = vmatpush1.bf16.msra.mxu1 %v1191_v19  ;;  %648 = vmatprep.mubr.bf16.mxu1 %v1102_v0 }
 0x874   :  { %618 = vmatprep.subr.bf16.mxu1 %v1197_v20 }
 0x877   :  { %619 = vmatpush1.bf16.msra.mxu1 %v1204_v21 }
 0x878   :  { %620 = vmatprep.subr.bf16.mxu1 %v1209_v22 }
 0x87b   :  { %621 = vmatpush1.bf16.msra.mxu1 %v1218_v23 }
 0x87c   :  { %622 = vmatprep.subr.bf16.mxu1 %v1228_v24 }
 0x87f   :  { %623 = vmatpush1.bf16.msra.mxu1 %v1233_v25 }
 0x880   :  { %624 = vmatprep.subr.bf16.mxu1 %v1241_v26 }
 0x883   :  { %625 = vmatpush1.bf16.msra.mxu1 %v1246_v27 }
 0x884   :  { %626 = vmatprep.subr.bf16.mxu1 %v1252_v28 }
 0x887   :  { %627 = vmatpush1.bf16.msra.mxu1 %v1260_v29 }
 0x888   :  { %628 = vmatprep.subr.bf16.mxu1 %v1267_v30 }
 0x88b   :  { %629 = vmatpush1.bf16.msra.mxu1 %v1274_v32 }
 0x88c   :  { %630 = vmatprep.subr.bf16.mxu1 %v1286_v34 }
 0x88f   :  { %631 = vmatpush1.bf16.msra.mxu1 %v1291_v35 }
 0x890   :  { %770 = vmatprep.subr.bf16.mxu1 %v1186_v18 }
 0x932   :  { %v496_v48 = vpop.f32.mrf.mxu1 }
 0x933   :  { %v518_v49 = vadd.f32 %v496_v48, %v111_v41 }
 0x934   :  { %v498_v50 = vpop.f32.mrf.mxu1 }
 0x935   :  { %v519_v51 = vmul.f32 %v518_v49, %v1170_v10  ;;  %v503_v52 = vmul.f32 %v498_v50, %v1170_v10 }
 0x936   :  { %v500_v53 = vpop.f32.mrf.mxu1 }
 0x937   :  { %1066 = vtanh.f32 %v519_v51 }
 0x938   :  { %1068 = vtanh.f32 %v503_v52  ;;  %v501_v54 = vpop.f32.mrf.mxu1 }
 0x944   :  { %v1067_v55 = vpop.eup %1066 }
 0x945   :  { %v1069_v56 = vpop.eup %1068  ;;  %v521_v57 = vmul.f32 0.5, %v1067_v55 }
 0x946   :  { %v505_v18 = vmul.f32 0.5, %v1069_v56 }
 0x947   :  { %v522_v58 = vadd.f32 0.5, %v521_v57 }
 0x948   :  { %v506_v59 = vadd.f32 0.5, %v505_v18 }
 0x949   :  { %v523_v60 = vsel %vm1158_vm2, %v1067_v55, %v522_v58 }
 0x94a   :  { %524 = vrot.lane.b32.xlu0 %v523_v60, %s1104_s1  ;;  %v507_v61 = vsel %vm1158_vm2, %v1069_v56, %v506_v59 }
 0x94b   :  { %508 = vrot.lane.b32.xlu1 %v507_v61, %s1104_s1 }
 0x9bc   :  { %v525_v62 = vpop.permute.xlu0 %524 }
 0x9bd   :  { %v526_v63 = vmul.f32 %v525_v62, %v523_v60  ;;  %v509_v1 = vpop.permute.xlu1 %508  ;;  %v527_v31 = vsel %vm1303_vm5, %v523_v60, %v525_v62 }
 0x9be   :  { %v510_v2 = vmul.f32 %v509_v1, %v507_v61  ;;  %v511_v8 = vsel %vm1303_vm5, %v507_v61, %v509_v1  ;;  %v530_v38 = vmul.f32 %v527_v31, %v1459_v16  ;;  %v43_v1 = vld [vmem:[%s1672_s0 + $0xc] sm:$0x3] }
 0x9bf   :  { %528 = vrot.lane.b32.xlu0 %v526_v63, %s1105_s7  ;;  %v514_v9 = vmul.f32 %v511_v8, %v1452_v14 }
 0x9c0   :  { %512 = vrot.lane.b32.xlu1 %v510_v2, %s1105_s7 }
 0x9c3   :  { %73 = vperm.xlu0 %1005, %v42_v7  }
 0xa31   :  { %v529_v33 = vpop.permute.xlu0 %528 }
 0xa32   :  { %v513_v11 = vpop.permute.xlu1 %512  ;;  %v1508_v39 = vadd.f32 %v530_v38, %v529_v33 }
 0xa33   :  { %v1501_v12 = vadd.f32 %v514_v9, %v513_v11 }
 0xa35   :  { %1070 = vtanh.f32 %v1501_v12 }
 0xa36   :  { %1072 = vtanh.f32 %v1508_v39 }
 0xa3e   :  { %v74_v16 = vpop.permute.xlu0 %73 }
 0xa3f   :  { %v97_v47 = vmul.f32 %v1156_v4, %v74_v16 }
 0xa41   :  { %v112_v42 = vadd.f32 %v1165_v6, %v97_v47 }
 0xa42   :  { %v1071_v13 = vpop.eup %1070 }
 0xa43   :  { %v517_v17 = vmul.f32 %v1071_v13, %v507_v61  ;;  %v1073_v14 = vpop.eup %1072 }
 0xa44   :  { %v533_v15 = vmul.f32 %v1073_v14, %v523_v60 }
 0xa45   :  { %534 = vrot.lane.b32.xlu1 %v517_v17, %s1104_s1 }
 0xab7   :  { %v535_v43 = vpop.permute.xlu1 %534 }
 0xab8   :  { %v536_v44 = vsel %vm35_vm6, 1.0, %v535_v43 }
 0xab9   :  { %v537_v45 = vsel %vm34_vm7, %v533_v15, %v536_v44 }
 0xaba   :  { %v538_v46 = vpack.c.bf16 %v537_v45, %v537_v45 }
 0xabc   :  { %572 = vmatmul.mubr.bf16.vlgmr.msra.gmra.mxu0 %v538_v46 }
 0xabd   :  { %694 = vmatpush1.bf16.msra.mxu0 %v1191_v19  ;;  %725 = vmatprep.mubr.bf16.mxu0 %v1102_v0 }
 0xabe   :  { %695 = vmatprep.subr.bf16.mxu0 %v1197_v20 }
 0xac1   :  { %696 = vmatpush1.bf16.msra.mxu0 %v1204_v21 }
 0xac2   :  { %697 = vmatprep.subr.bf16.mxu0 %v1209_v22 }
 0xac5   :  { %698 = vmatpush1.bf16.msra.mxu0 %v1218_v23 }
 0xac6   :  { %699 = vmatprep.subr.bf16.mxu0 %v1228_v24 }
 0xac9   :  { %700 = vmatpush1.bf16.msra.mxu0 %v1233_v25 }
 0xaca   :  { %701 = vmatprep.subr.bf16.mxu0 %v1241_v26 }
 0xacd   :  { %702 = vmatpush1.bf16.msra.mxu0 %v1246_v27 }
 0xace   :  { %703 = vmatprep.subr.bf16.mxu0 %v1252_v28 }
 0xad1   :  { %704 = vmatpush1.bf16.msra.mxu0 %v1260_v29 }
 0xad2   :  { %705 = vmatprep.subr.bf16.mxu0 %v1267_v30 }
 0xad5   :  { %706 = vmatpush1.bf16.msra.mxu0 %v1274_v32 }
 0xad6   :  { %707 = vmatprep.subr.bf16.mxu0 %v1286_v34 }
 0xad9   :  { %708 = vmatpush1.bf16.msra.mxu0 %v1291_v35 }
 0xada   :  { %979 = vmatprep.subr.bf16.mxu0 %v1106_v36 }
 0xb7c   :  { %v573_v40 = vpop.f32.mrf.mxu0 }
 0xb7d   :  { %v595_v41 = vadd.f32 %v573_v40, %v112_v42 }
 0xb7e   :  { %v575_v48 = vpop.f32.mrf.mxu0 }
 0xb7f   :  { %v596_v49 = vmul.f32 %v595_v41, %v1170_v10  ;;  %v580_v50 = vmul.f32 %v575_v48, %v1170_v10  ;;  %v44_v41 = vld [vmem:[%s1672_s0 + $0xe] sm:$0x3] }
 0xb80   :  { %v577_v51 = vpop.f32.mrf.mxu0 }
 0xb81   :  { %1074 = vtanh.f32 %v596_v49 }
 0xb82   :  { %1076 = vtanh.f32 %v580_v50  ;;  %v578_v52 = vpop.f32.mrf.mxu0 }
 0xb8e   :  { %v1075_v53 = vpop.eup %1074 }
 0xb8f   :  { %v1077_v54 = vpop.eup %1076  ;;  %v598_v55 = vmul.f32 0.5, %v1075_v53 }
 0xb90   :  { %v582_v56 = vmul.f32 0.5, %v1077_v54 }
 0xb91   :  { %v599_v57 = vadd.f32 0.5, %v598_v55 }
 0xb92   :  { %v583_v18 = vadd.f32 0.5, %v582_v56 }
 0xb93   :  { %v600_v58 = vsel %vm1158_vm2, %v1075_v53, %v599_v57 }
 0xb94   :  { %601 = vrot.lane.b32.xlu0 %v600_v58, %s1104_s1  ;;  %v584_v59 = vsel %vm1158_vm2, %v1077_v54, %v583_v18 }
 0xb95   :  { %585 = vrot.lane.b32.xlu1 %v584_v59, %s1104_s1 }
 0xc06   :  { %v602_v60 = vpop.permute.xlu0 %601 }
 0xc07   :  { %v603_v61 = vmul.f32 %v602_v60, %v600_v58  ;;  %v586_v62 = vpop.permute.xlu1 %585  ;;  %v604_v17 = vsel %vm1303_vm5, %v600_v58, %v602_v60 }
 0xc08   :  { %v587_v63 = vmul.f32 %v586_v62, %v584_v59  ;;  %v588_v2 = vsel %vm1303_vm5, %v584_v59, %v586_v62  ;;  %v607_v33 = vmul.f32 %v604_v17, %v1508_v39 }
 0xc09   :  { %605 = vrot.lane.b32.xlu0 %v603_v61, %s1105_s7  ;;  %v591_v7 = vmul.f32 %v588_v2, %v1501_v12 }
 0xc0a   :  { %589 = vrot.lane.b32.xlu1 %v587_v63, %s1105_s7 }
 0xc0d   :  { %78 = vperm.xlu0 %1005, %v43_v1  }
 0xc7b   :  { %v606_v31 = vpop.permute.xlu0 %605 }
 0xc7c   :  { %v590_v8 = vpop.permute.xlu1 %589  ;;  %v1557_v38 = vadd.f32 %v607_v33, %v606_v31 }
 0xc7d   :  { %v1550_v9 = vadd.f32 %v591_v7, %v590_v8 }
 0xc7f   :  { %1078 = vtanh.f32 %v1550_v9 }
 0xc80   :  { %1080 = vtanh.f32 %v1557_v38 }
 0xc8c   :  { %v1079_v11 = vpop.eup %1078 }
 0xc8d   :  { %v594_v13 = vmul.f32 %v1079_v11, %v584_v59  ;;  %v1081_v12 = vpop.eup %1080 }
 0xc8e   :  { %v610_v14 = vmul.f32 %v1081_v12, %v600_v58 }
 0xc8f   :  { %611 = vrot.lane.b32.xlu1 %v594_v13, %s1104_s1 }
 0xd01   :  { %v612_v15 = vpop.permute.xlu1 %611 }
 0xd02   :  { %v613_v43 = vsel %vm35_vm6, 1.0, %v612_v15 }
 0xd03   :  { %v614_v44 = vsel %vm34_vm7, %v610_v14, %v613_v43 }
 0xd04   :  { %v615_v45 = vpack.c.bf16 %v614_v44, %v614_v44 }
 0xd06   :  { %649 = vmatmul.mubr.bf16.vlgmr.msra.gmra.mxu1 %v615_v45 }
 0xd07   :  { %771 = vmatpush1.bf16.msra.mxu1 %v1191_v19  ;;  %802 = vmatprep.mubr.bf16.mxu1 %v1102_v0  ;;  %v79_v0 = vpop.permute.xlu0 %78 }
 0xd08   :  { %772 = vmatprep.subr.bf16.mxu1 %v1197_v20  ;;  %v98_v19 = vmul.f32 %v1156_v4, %v79_v0 }
 0xd0a   :  { %v113_v20 = vadd.f32 %v1165_v6, %v98_v19 }
 0xd0b   :  { %773 = vmatpush1.bf16.msra.mxu1 %v1204_v21 }
 0xd0c   :  { %774 = vmatprep.subr.bf16.mxu1 %v1209_v22 }
 0xd0f   :  { %775 = vmatpush1.bf16.msra.mxu1 %v1218_v23 }
 0xd10   :  { %776 = vmatprep.subr.bf16.mxu1 %v1228_v24 }
 0xd13   :  { %777 = vmatpush1.bf16.msra.mxu1 %v1233_v25 }
 0xd14   :  { %778 = vmatprep.subr.bf16.mxu1 %v1241_v26 }
 0xd17   :  { %779 = vmatpush1.bf16.msra.mxu1 %v1246_v27 }
 0xd18   :  { %780 = vmatprep.subr.bf16.mxu1 %v1252_v28 }
 0xd1b   :  { %781 = vmatpush1.bf16.msra.mxu1 %v1260_v29 }
 0xd1c   :  { %782 = vmatprep.subr.bf16.mxu1 %v1267_v30 }
 0xd1f   :  { %783 = vmatpush1.bf16.msra.mxu1 %v1274_v32 }
 0xd20   :  { %784 = vmatprep.subr.bf16.mxu1 %v1286_v34 }
 0xd23   :  { %785 = vmatpush1.bf16.msra.mxu1 %v1291_v35 }
 0xdc6   :  { %v650_v21 = vpop.f32.mrf.mxu1 }
 0xdc7   :  { %v672_v22 = vadd.f32 %v650_v21, %v113_v20 }
 0xdc8   :  { %v652_v23 = vpop.f32.mrf.mxu1 }
 0xdc9   :  { %v673_v24 = vmul.f32 %v672_v22, %v1170_v10  ;;  %v657_v25 = vmul.f32 %v652_v23, %v1170_v10 }
 0xdca   :  { %v654_v26 = vpop.f32.mrf.mxu1 }
 0xdcb   :  { %1082 = vtanh.f32 %v673_v24 }
 0xdcc   :  { %1084 = vtanh.f32 %v657_v25  ;;  %v655_v27 = vpop.f32.mrf.mxu1 }
 0xdd8   :  { %v1083_v28 = vpop.eup %1082 }
 0xdd9   :  { %v1085_v29 = vpop.eup %1084  ;;  %v675_v30 = vmul.f32 0.5, %v1083_v28 }
 0xdda   :  { %v659_v32 = vmul.f32 0.5, %v1085_v29 }
 0xddb   :  { %v676_v34 = vadd.f32 0.5, %v675_v30 }
 0xddc   :  { %v660_v35 = vadd.f32 0.5, %v659_v32 }
 0xddd   :  { %v677_v39 = vsel %vm1158_vm2, %v1083_v28, %v676_v34 }
 0xdde   :  { %678 = vrot.lane.b32.xlu0 %v677_v39, %s1104_s1  ;;  %v661_v46 = vsel %vm1158_vm2, %v1085_v29, %v660_v35 }
 0xddf   :  { %662 = vrot.lane.b32.xlu1 %v661_v46, %s1104_s1 }
 0xe50   :  { %v679_v16 = vpop.permute.xlu0 %678 }
 0xe51   :  { %v680_v47 = vmul.f32 %v679_v16, %v677_v39  ;;  %v663_v42 = vpop.permute.xlu1 %662  ;;  %v681_v54 = vsel %vm1303_vm5, %v677_v39, %v679_v16 }
 0xe52   :  { %v664_v40 = vmul.f32 %v663_v42, %v661_v46  ;;  %v665_v48 = vsel %vm1303_vm5, %v661_v46, %v663_v42  ;;  %v684_v56 = vmul.f32 %v681_v54, %v1557_v38  ;;  %v1034_v54 = vld [vmem:[%s1676_s4 + $0x18] sm:$0xff]  }
 0xe53   :  { %682 = vrot.lane.b32.xlu0 %v680_v47, %s1105_s7  ;;  %v668_v49 = vmul.f32 %v665_v48, %v1550_v9  ;;  %v1030_v48 = vld [vmem:[%s1676_s4 + $0x38] sm:$0xff]  }
 0xe54   :  { %666 = vrot.lane.b32.xlu1 %v664_v40, %s1105_s7 }
 0xe57   :  { %83 = vperm.xlu0 %1005, %v44_v41  }
 0xec5   :  { %v683_v55 = vpop.permute.xlu0 %682 }
 0xec6   :  { %v667_v50 = vpop.permute.xlu1 %666  ;;  %v685_v57 = vadd.f32 %v684_v56, %v683_v55  ;;  %v1036_v55 = vld [vmem:[%s1676_s4 + $0x8] sm:$0xff]  }
 0xec7   :  { %v669_v51 = vadd.f32 %v668_v49, %v667_v50  ;;  %v1031_v49 = vld [vmem:[%s1676_s4 + $0x30] sm:$0xff]  }
 0xec9   :  { %1086 = vtanh.f32 %v669_v51 }
 0xeca   :  { %1088 = vtanh.f32 %v685_v57 }
 0xed2   :  { %v84_v63 = vpop.permute.xlu0 %83 }
 0xed3   :  { %v99_v1 = vmul.f32 %v1156_v4, %v84_v63 }
 0xed5   :  { %v114_v2 = vadd.f32 %v1165_v6, %v99_v1 }
 0xed6   :  { %v1087_v52 = vpop.eup %1086 }
 0xed7   :  { %v671_v53 = vmul.f32 %v1087_v52, %v661_v46  ;;  %v1089_v18 = vpop.eup %1088 }
 0xed8   :  { %v687_v58 = vmul.f32 %v1089_v18, %v677_v39  ;;  %v1037_v18 = vld [vmem:[%s1676_s4] sm:$0xff]  }
 0xed9   :  { %688 = vrot.lane.b32.xlu1 %v671_v53, %s1104_s1  ;;  %v1033_v53 = vld [vmem:[%s1676_s4 + $0x20] sm:$0xff]  }
 0xf4b   :  { %v689_v59 = vpop.permute.xlu1 %688 }
 0xf4c   :  { %v690_v60 = vsel %vm35_vm6, 1.0, %v689_v59 }
 0xf4d   :  { %v691_v61 = vsel %vm34_vm7, %v687_v58, %v690_v60  ;;  %v11_v58 = vstv %s1677_s5 }
 0xf4e   :  { %v692_v62 = vpack.c.bf16 %v691_v61, %v691_v61  ;;  %12 = vst [vmem:[#allocation2] sm:$0x1] %v11_v58 }
 0xf50   :  { %726 = vmatmul.mubr.bf16.vlgmr.msra.gmra.mxu0 %v692_v62 }
 0xf51   :  { %980 = vmatpush3.bf16.msra.mxu0 %v1030_v48  ;;  %995 = vmatprep.mubr.msk.bf16.mxu0 %vm1107_vm8, %v1106_v36 }
 0xf52   :  { %981 = vmatprep.subr.bf16.mxu0 %v1106_v36 }
 0xf55   :  { %982 = vmatpush3.bf16.msra.mxu0 %v1031_v49 }
 0xf56   :  { %983 = vmatprep.subr.bf16.mxu0 %v1106_v36 }
0x1010   :  { %v727_v7 = vpop.f32.mrf.mxu0 }
0x1011   :  { %v749_v8 = vadd.f32 %v727_v7, %v114_v2  ;;  %v961_v7 = vld [vmem:[#allocation2] ss:$0 sm:$0xff] }
0x1012   :  { %v729_v9 = vpop.f32.mrf.mxu0 }
0x1013   :  { %v750_v11 = vmul.f32 %v749_v8, %v1170_v10  ;;  %v734_v13 = vmul.f32 %v729_v9, %v1170_v10 }
0x1014   :  { %v731_v17 = vpop.f32.mrf.mxu0 }
0x1015   :  { %1090 = vtanh.f32 %v750_v11 }
0x1016   :  { %1092 = vtanh.f32 %v734_v13  ;;  %v732_v31 = vpop.f32.mrf.mxu0 }
0x1022   :  { %v1091_v33 = vpop.eup %1090 }
0x1023   :  { %v1093_v38 = vpop.eup %1092  ;;  %v752_v12 = vmul.f32 0.5, %v1091_v33 }
0x1024   :  { %v736_v14 = vmul.f32 0.5, %v1093_v38 }
0x1025   :  { %v753_v15 = vadd.f32 0.5, %v752_v12 }
0x1026   :  { %v737_v43 = vadd.f32 0.5, %v736_v14 }
0x1027   :  { %v754_v4 = vsel %vm1158_vm2, %v1091_v33, %v753_v15 }
0x1028   :  { %755 = vrot.lane.b32.xlu0 %v754_v4, %s1104_s1  ;;  %v738_v6 = vsel %vm1158_vm2, %v1093_v38, %v737_v43 }
0x1029   :  { %739 = vrot.lane.b32.xlu1 %v738_v6, %s1104_s1 }
0x109a   :  { %v756_v44 = vpop.permute.xlu0 %755 }
0x109b   :  { %v757_v45 = vmul.f32 %v756_v44, %v754_v4  ;;  %v740_v0 = vpop.permute.xlu1 %739  ;;  %v758_v26 = vsel %vm1303_vm5, %v754_v4, %v756_v44 }
0x109c   :  { %v741_v19 = vmul.f32 %v740_v0, %v738_v6  ;;  %v742_v20 = vsel %vm1303_vm5, %v738_v6, %v740_v0  ;;  %v761_v28 = vmul.f32 %v758_v26, %v685_v57 }
0x109d   :  { %759 = vrot.lane.b32.xlu0 %v757_v45, %s1105_s7  ;;  %v745_v21 = vmul.f32 %v742_v20, %v669_v51 }
0x109e   :  { %743 = vrot.lane.b32.xlu1 %v741_v19, %s1105_s7 }
0x110f   :  { %v760_v27 = vpop.permute.xlu0 %759 }
0x1110   :  { %v744_v22 = vpop.permute.xlu1 %743  ;;  %v762_v29 = vadd.f32 %v761_v28, %v760_v27 }
0x1111   :  { %v746_v23 = vadd.f32 %v745_v21, %v744_v22 }
0x1113   :  { %1094 = vtanh.f32 %v746_v23 }
0x1114   :  { %1096 = vtanh.f32 %v762_v29 }
0x1120   :  { %v1095_v24 = vpop.eup %1094 }
0x1121   :  { %v748_v25 = vmul.f32 %v1095_v24, %v738_v6  ;;  %v1097_v30 = vpop.eup %1096 }
0x1122   :  { %v764_v32 = vmul.f32 %v1097_v30, %v754_v4 }
0x1123   :  { %765 = vrot.lane.b32.xlu1 %v748_v25, %s1104_s1 }
0x1195   :  { %v766_v34 = vpop.permute.xlu1 %765 }
0x1196   :  { %v767_v35 = vsel %vm35_vm6, 1.0, %v766_v34 }
0x1197   :  { %v768_v39 = vsel %vm34_vm7, %v764_v32, %v767_v35 }
0x1198   :  { %v769_v46 = vpack.c.bf16 %v768_v39, %v768_v39 }
0x119a   :  { %803 = vmatmul.mubr.bf16.vlgmr.msra.gmra.mxu1 %v769_v46 }
0x125a   :  { %v804_v16 = vpop.f32.mrf.mxu1 }
0x125c   :  { %v805_v47 = vpop.f32.mrf.mxu1 }
0x125d   :  { %v810_v42 = vmul.f32 %v805_v47, %v1170_v10  ;;  %v1032_v10 = vld [vmem:[%s1676_s4 + $0x28] sm:$0xff]  }
0x125e   :  { %v807_v40 = vpop.f32.mrf.mxu1  ;;  %984 = vmatpush3.bf16.msra.mxu0 %v1032_v10 }
0x125f   :  { %1098 = vtanh.f32 %v810_v42  ;;  %985 = vmatprep.subr.bf16.mxu0 %v1106_v36 }
0x1260   :  { %v808_v41 = vpop.f32.mrf.mxu1 }
0x1262   :  { %986 = vmatpush3.bf16.msra.mxu0 %v1033_v53 }
0x1263   :  { %987 = vmatprep.subr.bf16.mxu0 %v1106_v36 }
0x1266   :  { %988 = vmatpush3.bf16.msra.mxu0 %v1034_v54 }
0x1267   :  { %989 = vmatprep.subr.bf16.mxu0 %v1106_v36 }
0x126a   :  { %990 = vmatpush3.bf16.msra.mxu0 %v1035_v5 }
0x126b   :  { %991 = vmatprep.subr.bf16.mxu0 %v1106_v36 }
0x126c   :  { %v1099_v3 = vpop.eup %1098 }
0x126d   :  { %v812_v50 = vmul.f32 0.5, %v1099_v3 }
0x126e   :  { %992 = vmatpush3.bf16.msra.mxu0 %v1036_v55 }
0x126f   :  { %v813_v51 = vadd.f32 0.5, %v812_v50  ;;  %993 = vmatprep.subr.bf16.mxu0 %v1106_v36 }
0x1271   :  { %v814_v52 = vsel %vm1158_vm2, %v1099_v3, %v813_v51 }
0x1272   :  { %815 = vrot.lane.b32.xlu0 %v814_v52, %s1104_s1  ;;  %994 = vmatpush3.bf16.msra.mxu0 %v1037_v18 }
0x12e4   :  { %v816_v56 = vpop.permute.xlu0 %815 }
0x12e5   :  { %v817_v57 = vmul.f32 %v816_v56, %v814_v52  ;;  %v818_v59 = vsel %vm1303_vm5, %v814_v52, %v816_v56 }
0x12e6   :  { %v821_v60 = vmul.f32 %v818_v59, %v746_v23 }
0x12e7   :  { %819 = vrot.lane.b32.xlu1 %v817_v57, %s1105_s7 }
0x1359   :  { %v820_v61 = vpop.permute.xlu1 %819 }
0x135a   :  { %v822_v62 = vadd.f32 %v821_v60, %v820_v61 }
0x135c   :  { %1100 = vtanh.f32 %v822_v62 }
0x1369   :  { %v1101_v63 = vpop.eup %1100 }
0x136a   :  { %v824_v1 = vmul.f32 %v1101_v63, %v814_v52 }
0x136c   :  { %v825_v2 = vpack.c.bf16 %v824_v1, %v824_v1 }
0x136e   :  { %996 = vmatmul.mubr.bf16.vlgmr.msra.gmra.mxu0 %v825_v2 }
0x142e   :  { %v931_v8 = vpop.f32.mrf.mxu0 }
0x142f   :  { %v932_v36 = vadd.f32 %v961_v7, %v931_v8 }
0x1430   :  { %v997_v9 = vpop.f32.mrf.mxu0 }
0x1431   :  { %938 = vst.msk [vmem:[%s1678_s6] sm:$0x3] %vm937_vm9, %v932_v36 }
0x1432   :  { %v934_v11 = vpop.f32.mrf.mxu0 }
0x1434   :  { %v998_v37 = vpop.f32.mrf.mxu0 }

</bundles_post_ra>
